<compile_context>
chip_gen: v7x
topology: tpu7x:2x2x1
jax: 0.10.0
libtpu: 0.0.40
codegen_flags: <defaults>
</compile_context>

<pallas_src>
import functools

import jax
import jax.numpy as jnp
from jax.experimental import pallas as pl
from jax.experimental.pallas import tpu as pltpu


# ----------------------------------------------------------------------------
# Fused kernel: all LSTM layers + Linear(H, C) + Softmax in one pallas_call.
# ----------------------------------------------------------------------------
def _make_fused_kernel(T, B, H, C, num_layers):
    """Build the fused LSTM-stack + classifier kernel for a static config."""

    def kernel(x_ref, *rest):
        # rest = [w_ih_0, w_hh_0, b_0, ..., w_ih_{L-1}, w_hh_{L-1}, b_{L-1},
        #         cls_w, cls_b, out_ref, gpre_sc, hs_sc]
        layer_refs = rest[: 3 * num_layers]
        cls_w_ref = rest[3 * num_layers]
        cls_b_ref = rest[3 * num_layers + 1]
        out_ref = rest[3 * num_layers + 2]
        gpre_sc = rest[3 * num_layers + 3]   # (T*B, 4H) f32: precomputed x @ W_ih^T + b
        hs_sc = rest[3 * num_layers + 4]     # (T*B, H)  f32: hidden sequence for next layer

        h = None
        for l in range(num_layers):
            w_ih_ref = layer_refs[3 * l]
            w_hh_ref = layer_refs[3 * l + 1]
            b_ref = layer_refs[3 * l + 2]

            # ---- Phase 1: hoisted input projection (one tall MXU matmul) ----
            xin = x_ref[...] if l == 0 else hs_sc[...]          # (T*B, D_in)
            gpre_sc[...] = (
                jnp.dot(
                    xin.astype(jnp.bfloat16),
                    w_ih_ref[...].astype(jnp.bfloat16),
                    preferred_element_type=jnp.float32,
                )
                + b_ref[...]                                     # (1, 4H) broadcast
            )

            # ---- Phase 2: recurrence (only h @ W_hh^T on the serial path) ----
            w_hh_bf16 = w_hh_ref[...].astype(jnp.bfloat16)       # resident, cast once
            h = jnp.zeros((B, H), jnp.float32)                   # PyTorch hidden=None
            c = jnp.zeros((B, H), jnp.float32)
            # T is small & static -> fully unrolled; h/c live in vregs.
            for t in range(T):
                gates = gpre_sc[pl.ds(t * B, B), :] + jnp.dot(
                    h.astype(jnp.bfloat16), w_hh_bf16,
                    preferred_element_type=jnp.float32,
                )                                                 # (B, 4H) f32
                # Gate order matches PyTorch: i, f, g, o.
                # (For real model sizes pick H as a multiple of 128 so these
                #  slices are lane-aligned; at H=32 they are sub-lane slices.)
                i = jax.nn.sigmoid(gates[:, 0 * H:1 * H])
                f = jax.nn.sigmoid(gates[:, 1 * H:2 * H])
                g = jnp.tanh(gates[:, 2 * H:3 * H])
                o = jax.nn.sigmoid(gates[:, 3 * H:4 * H])
                c = f * c + i * g
                h = o * jnp.tanh(c)
                if l < num_layers - 1:
                    # Hidden sequence only needed as the next layer's input;
                    # the last layer never materializes it (only final h used).
                    hs_sc[pl.ds(t * B, B), :] = h

        # ---- Phase 3: classifier — Dropout(eval)=identity, Linear, Softmax ----
        # TODO(synk): training-mode dropout not implemented (eval = identity).
        logits = (
            jnp.dot(
                h.astype(jnp.bfloat16),
                cls_w_ref[...].astype(jnp.bfloat16),
                preferred_element_type=jnp.float32,
            )
            + cls_b_ref[...]
        )                                                         # (B, C)
        m = jnp.max(logits, axis=-1, keepdims=True)
        e = jnp.exp(logits - m)
        out_ref[...] = (e / jnp.sum(e, axis=-1, keepdims=True)).astype(out_ref.dtype)

    return kernel


def lstm_net_fused(x2d, lstm_layers, cls_w_t, cls_b, *, T, B):
    """x2d: (T*B, E) time-major-flattened embedded inputs.  Returns (B, C)."""
    E = x2d.shape[1]
    H = lstm_layers[0]["w_hh_t"].shape[0]
    C = cls_w_t.shape[1]
    L = len(lstm_layers)

    kernel = _make_fused_kernel(T, B, H, C, L)

    in_arrays = [x2d]
    in_specs = [pl.BlockSpec((T * B, E), lambda: (0, 0))]
    for layer in lstm_layers:
        d_in = layer["w_ih_t"].shape[0]
        in_arrays += [layer["w_ih_t"], layer["w_hh_t"], layer["bias"]]
        in_specs += [
            pl.BlockSpec((d_in, 4 * H), lambda: (0, 0)),
            pl.BlockSpec((H, 4 * H), lambda: (0, 0)),
            pl.BlockSpec((1, 4 * H), lambda: (0, 0)),
        ]
    in_arrays += [cls_w_t, cls_b]
    in_specs += [
        pl.BlockSpec((H, C), lambda: (0, 0)),
        pl.BlockSpec((1, C), lambda: (0, 0)),
    ]

    return pl.pallas_call(
        kernel,
        out_shape=jax.ShapeDtypeStruct((B, C), jnp.float32),
        in_specs=in_specs,
        out_specs=pl.BlockSpec((B, C), lambda: (0, 0)),
        scratch_shapes=[
            pltpu.VMEM((T * B, 4 * H), jnp.float32),   # precomputed input gates
            pltpu.VMEM((T * B, H), jnp.float32),       # inter-layer hidden sequence
        ],
    )(*in_arrays)


# ----------------------------------------------------------------------------
# Full model forward (embedding gather stays in plain JAX glue).
# ----------------------------------------------------------------------------
@jax.jit
def lstm_net_forward(tokens, params):
    B, T = tokens.shape
    x = jnp.take(params["embedding"], tokens, axis=0)        # (B, T, E) gather
    x = jnp.transpose(x, (1, 0, 2)).astype(jnp.float32)       # (T, B, E) time-major
    x2d = x.reshape(T * B, x.shape[-1])                        # flat (T*B, E)
    return lstm_net_fused(
        x2d, params["lstm_layers"], params["cls_w_t"], params["cls_b"], T=T, B=B
    )


def init_params(key, vocab, emb_dim, hidden_dim, num_layers, num_classes=5):
    params = {}
    k_emb, key = jax.random.split(key)
    params["embedding"] = jax.random.normal(
        k_emb, (vocab, emb_dim), dtype=jnp.float32)

    scale = 1.0 / jnp.sqrt(hidden_dim)
    layers = []
    for l in range(num_layers):
        d_in = emb_dim if l == 0 else hidden_dim
        k1, k2, k3, k4, key = jax.random.split(key, 5)
        w_ih = jax.random.uniform(k1, (4 * hidden_dim, d_in),
                                  minval=-scale, maxval=scale)
        w_hh = jax.random.uniform(k2, (4 * hidden_dim, hidden_dim),
                                  minval=-scale, maxval=scale)
        b_ih = jax.random.uniform(k3, (4 * hidden_dim,),
                                  minval=-scale, maxval=scale)
        b_hh = jax.random.uniform(k4, (4 * hidden_dim,),
                                  minval=-scale, maxval=scale)
        layers.append({
            "w_ih_t": w_ih.T.astype(jnp.float32),             # (D_in, 4H)
            "w_hh_t": w_hh.T.astype(jnp.float32),             # (H, 4H)
            "bias": (b_ih + b_hh).reshape(1, -1).astype(jnp.float32),
        })
    params["lstm_layers"] = layers

    k5, k6, key = jax.random.split(key, 3)
    cls_scale = 1.0 / jnp.sqrt(hidden_dim)
    cls_w = jax.random.uniform(k5, (num_classes, hidden_dim),
                               minval=-cls_scale, maxval=cls_scale)
    cls_b = jax.random.uniform(k6, (num_classes,),
                               minval=-cls_scale, maxval=cls_scale)
    params["cls_w_t"] = cls_w.T.astype(jnp.float32)           # (H, C)
    params["cls_b"] = cls_b.reshape(1, -1).astype(jnp.float32)
    return params


if __name__ == "__main__":
    VOCAB, EMB_DIM, HIDDEN, LAYERS = 50, 16, 32, 2
    B, T = 2, 8

    key = jax.random.PRNGKey(0)
    k_tok, k_par = jax.random.split(key)
    params = init_params(k_par, VOCAB, EMB_DIM, HIDDEN, LAYERS)
    tokens = jax.random.randint(k_tok, (B, T), 0, VOCAB, dtype=jnp.int32)

    probs = lstm_net_forward(tokens, params)
    jax.block_until_ready(probs)

    assert probs.shape == (B, 5)
    assert bool(jnp.allclose(jnp.sum(probs, axis=-1), 1.0, atol=1e-5))
    print("KERNEL_OK")
</pallas_src>

<mosaic_0001>
module attributes {stable_mosaic.version = 11 : i64} {
  func.func @kernel(%arg0: memref<16x16xf32, #tpu.memory_space<vmem>>, %arg1: memref<16x128xf32, #tpu.memory_space<vmem>>, %arg2: memref<32x128xf32, #tpu.memory_space<vmem>>, %arg3: memref<1x128xf32, #tpu.memory_space<vmem>>, %arg4: memref<32x128xf32, #tpu.memory_space<vmem>>, %arg5: memref<32x128xf32, #tpu.memory_space<vmem>>, %arg6: memref<1x128xf32, #tpu.memory_space<vmem>>, %arg7: memref<32x5xf32, #tpu.memory_space<vmem>>, %arg8: memref<1x5xf32, #tpu.memory_space<vmem>>, %arg9: memref<2x5xf32, #tpu.memory_space<vmem>>, %arg10: memref<16x128xf32, #tpu.memory_space<vmem>>, %arg11: memref<16x32xf32, #tpu.memory_space<vmem>>) attributes {dimension_semantics = [], scalar_prefetch = 0 : i64, scratch_operands = 2 : i64, tpu.core_type = #tpu.core_type<tc>} {
    %c0 = arith.constant 0 : index
    %c0_0 = arith.constant 0 : index
    %0 = vector.load %arg0[%c0, %c0_0] : memref<16x16xf32, #tpu.memory_space<vmem>>, vector<16x16xf32>
    %1 = arith.truncf %0 : vector<16x16xf32> to vector<16x16xbf16>
    %c0_1 = arith.constant 0 : index
    %c0_2 = arith.constant 0 : index
    %2 = vector.load %arg1[%c0_1, %c0_2] : memref<16x128xf32, #tpu.memory_space<vmem>>, vector<16x128xf32>
    %3 = arith.truncf %2 : vector<16x128xf32> to vector<16x128xbf16>
    %cst = arith.constant dense<0.000000e+00> : vector<16x128xf32>
    %4 = tpu.matmul %1, %3, %cst {dimension_numbers = #tpu.dot_dimension_numbers<[1], [0], [0], [1], [0, 0, 1, 1], [], []>} : vector<16x16xbf16>, vector<16x128xbf16>, vector<16x128xf32> -> vector<16x128xf32>
    %c0_3 = arith.constant 0 : index
    %c0_4 = arith.constant 0 : index
    %5 = vector.load %arg3[%c0_3, %c0_4] : memref<1x128xf32, #tpu.memory_space<vmem>>, vector<1x128xf32>
    %6 = vector.broadcast %5 : vector<1x128xf32> to vector<16x128xf32>
    %7 = arith.addf %4, %6 : vector<16x128xf32>
    %c0_5 = arith.constant 0 : index
    %c0_6 = arith.constant 0 : index
    %8 = vector.load %arg10[%c0_5, %c0_6] : memref<16x128xf32, #tpu.memory_space<vmem>>, vector<16x128xf32>
    tpu.vector_store %arg10[%c0_5, %c0_6], %7 {strides = array<i32>} : memref<16x128xf32, #tpu.memory_space<vmem>>, vector<16x128xf32>,
    %c0_7 = arith.constant 0 : index
    %c0_8 = arith.constant 0 : index
    %9 = vector.load %arg2[%c0_7, %c0_8] : memref<32x128xf32, #tpu.memory_space<vmem>>, vector<32x128xf32>
    %10 = arith.truncf %9 : vector<32x128xf32> to vector<32x128xbf16>
    %cst_9 = arith.constant 0.000000e+00 : f32
    %11 = vector.broadcast %cst_9 : f32 to vector<2x32xf32>
    %cst_10 = arith.constant 0.000000e+00 : f32
    %12 = vector.broadcast %cst_10 : f32 to vector<2x32xf32>
    %c0_11 = arith.constant 0 : index
    %c0_12 = arith.constant 0 : index
    %13 = vector.load %arg10[%c0_11, %c0_12] : memref<16x128xf32, #tpu.memory_space<vmem>>, vector<2x128xf32>
    %14 = arith.truncf %11 : vector<2x32xf32> to vector<2x32xbf16>
    %cst_13 = arith.constant dense<0.000000e+00> : vector<2x128xf32>
    %15 = tpu.matmul %14, %10, %cst_13 {dimension_numbers = #tpu.dot_dimension_numbers<[1], [0], [0], [1], [0, 0, 1, 1], [], []>} : vector<2x32xbf16>, vector<32x128xbf16>, vector<2x128xf32> -> vector<2x128xf32>
    %16 = arith.addf %13, %15 : vector<2x128xf32>
    %17 = vector.extract_strided_slice %16 {offsets = [0, 0], sizes = [2, 32], strides = [1, 1]} : vector<2x128xf32> to vector<2x32xf32>
    %18 = arith.negf %17 : vector<2x32xf32>
    %19 = math.exp %18 : vector<2x32xf32>
    %cst_14 = arith.constant 1.000000e+00 : f32
    %20 = vector.broadcast %cst_14 : f32 to vector<2x32xf32>
    %21 = arith.addf %20, %19 : vector<2x32xf32>
    %22 = arith.divf %20, %21 : vector<2x32xf32>
    %23 = vector.extract_strided_slice %16 {offsets = [0, 32], sizes = [2, 32], strides = [1, 1]} : vector<2x128xf32> to vector<2x32xf32>
    %24 = arith.negf %23 : vector<2x32xf32>
    %25 = math.exp %24 : vector<2x32xf32>
    %cst_15 = arith.constant 1.000000e+00 : f32
    %26 = vector.broadcast %cst_15 : f32 to vector<2x32xf32>
    %27 = arith.addf %26, %25 : vector<2x32xf32>
    %28 = arith.divf %26, %27 : vector<2x32xf32>
    %29 = vector.extract_strided_slice %16 {offsets = [0, 64], sizes = [2, 32], strides = [1, 1]} : vector<2x128xf32> to vector<2x32xf32>
    %30 = math.tanh %29 : vector<2x32xf32>
    %31 = vector.extract_strided_slice %16 {offsets = [0, 96], sizes = [2, 32], strides = [1, 1]} : vector<2x128xf32> to vector<2x32xf32>
    %32 = arith.negf %31 : vector<2x32xf32>
    %33 = math.exp %32 : vector<2x32xf32>
    %cst_16 = arith.constant 1.000000e+00 : f32
    %34 = vector.broadcast %cst_16 : f32 to vector<2x32xf32>
    %35 = arith.addf %34, %33 : vector<2x32xf32>
    %36 = arith.divf %34, %35 : vector<2x32xf32>
    %37 = arith.mulf %28, %12 : vector<2x32xf32>
    %38 = arith.mulf %22, %30 : vector<2x32xf32>
    %39 = arith.addf %37, %38 : vector<2x32xf32>
    %40 = math.tanh %39 : vector<2x32xf32>
    %41 = arith.mulf %36, %40 : vector<2x32xf32>
    %c0_17 = arith.constant 0 : index
    %c0_18 = arith.constant 0 : index
    %42 = vector.load %arg11[%c0_17, %c0_18] : memref<16x32xf32, #tpu.memory_space<vmem>>, vector<2x32xf32>
    tpu.vector_store %arg11[%c0_17, %c0_18], %41 {strides = array<i32>} : memref<16x32xf32, #tpu.memory_space<vmem>>, vector<2x32xf32>,
    %c2 = arith.constant 2 : index
    %c0_19 = arith.constant 0 : index
    %43 = vector.load %arg10[%c2, %c0_19] : memref<16x128xf32, #tpu.memory_space<vmem>>, vector<2x128xf32>
    %44 = arith.truncf %41 : vector<2x32xf32> to vector<2x32xbf16>
    %cst_20 = arith.constant dense<0.000000e+00> : vector<2x128xf32>
    %45 = tpu.matmul %44, %10, %cst_20 {dimension_numbers = #tpu.dot_dimension_numbers<[1], [0], [0], [1], [0, 0, 1, 1], [], []>} : vector<2x32xbf16>, vector<32x128xbf16>, vector<2x128xf32> -> vector<2x128xf32>
    %46 = arith.addf %43, %45 : vector<2x128xf32>
    %47 = vector.extract_strided_slice %46 {offsets = [0, 0], sizes = [2, 32], strides = [1, 1]} : vector<2x128xf32> to vector<2x32xf32>
    %48 = arith.negf %47 : vector<2x32xf32>
    %49 = math.exp %48 : vector<2x32xf32>
    %cst_21 = arith.constant 1.000000e+00 : f32
    %50 = vector.broadcast %cst_21 : f32 to vector<2x32xf32>
    %51 = arith.addf %50, %49 : vector<2x32xf32>
    %52 = arith.divf %50, %51 : vector<2x32xf32>
    %53 = vector.extract_strided_slice %46 {offsets = [0, 32], sizes = [2, 32], strides = [1, 1]} : vector<2x128xf32> to vector<2x32xf32>
    %54 = arith.negf %53 : vector<2x32xf32>
    %55 = math.exp %54 : vector<2x32xf32>
    %cst_22 = arith.constant 1.000000e+00 : f32
    %56 = vector.broadcast %cst_22 : f32 to vector<2x32xf32>
    %57 = arith.addf %56, %55 : vector<2x32xf32>
    %58 = arith.divf %56, %57 : vector<2x32xf32>
    %59 = vector.extract_strided_slice %46 {offsets = [0, 64], sizes = [2, 32], strides = [1, 1]} : vector<2x128xf32> to vector<2x32xf32>
    %60 = math.tanh %59 : vector<2x32xf32>
    %61 = vector.extract_strided_slice %46 {offsets = [0, 96], sizes = [2, 32], strides = [1, 1]} : vector<2x128xf32> to vector<2x32xf32>
    %62 = arith.negf %61 : vector<2x32xf32>
    %63 = math.exp %62 : vector<2x32xf32>
    %cst_23 = arith.constant 1.000000e+00 : f32
    %64 = vector.broadcast %cst_23 : f32 to vector<2x32xf32>
    %65 = arith.addf %64, %63 : vector<2x32xf32>
    %66 = arith.divf %64, %65 : vector<2x32xf32>
    %67 = arith.mulf %58, %39 : vector<2x32xf32>
    %68 = arith.mulf %52, %60 : vector<2x32xf32>
    %69 = arith.addf %67, %68 : vector<2x32xf32>
    %70 = math.tanh %69 : vector<2x32xf32>
    %71 = arith.mulf %66, %70 : vector<2x32xf32>
    %c2_24 = arith.constant 2 : index
    %c0_25 = arith.constant 0 : index
    %72 = vector.load %arg11[%c2_24, %c0_25] : memref<16x32xf32, #tpu.memory_space<vmem>>, vector<2x32xf32>
    tpu.vector_store %arg11[%c2_24, %c0_25], %71 {strides = array<i32>} : memref<16x32xf32, #tpu.memory_space<vmem>>, vector<2x32xf32>,
    %c4 = arith.constant 4 : index
    %c0_26 = arith.constant 0 : index
    %73 = vector.load %arg10[%c4, %c0_26] : memref<16x128xf32, #tpu.memory_space<vmem>>, vector<2x128xf32>
    %74 = arith.truncf %71 : vector<2x32xf32> to vector<2x32xbf16>
    %cst_27 = arith.constant dense<0.000000e+00> : vector<2x128xf32>
    %75 = tpu.matmul %74, %10, %cst_27 {dimension_numbers = #tpu.dot_dimension_numbers<[1], [0], [0], [1], [0, 0, 1, 1], [], []>} : vector<2x32xbf16>, vector<32x128xbf16>, vector<2x128xf32> -> vector<2x128xf32>
    %76 = arith.addf %73, %75 : vector<2x128xf32>
    %77 = vector.extract_strided_slice %76 {offsets = [0, 0], sizes = [2, 32], strides = [1, 1]} : vector<2x128xf32> to vector<2x32xf32>
    %78 = arith.negf %77 : vector<2x32xf32>
    %79 = math.exp %78 : vector<2x32xf32>
    %cst_28 = arith.constant 1.000000e+00 : f32
    %80 = vector.broadcast %cst_28 : f32 to vector<2x32xf32>
    %81 = arith.addf %80, %79 : vector<2x32xf32>
    %82 = arith.divf %80, %81 : vector<2x32xf32>
    %83 = vector.extract_strided_slice %76 {offsets = [0, 32], sizes = [2, 32], strides = [1, 1]} : vector<2x128xf32> to vector<2x32xf32>
    %84 = arith.negf %83 : vector<2x32xf32>
    %85 = math.exp %84 : vector<2x32xf32>
    %cst_29 = arith.constant 1.000000e+00 : f32
    %86 = vector.broadcast %cst_29 : f32 to vector<2x32xf32>
    %87 = arith.addf %86, %85 : vector<2x32xf32>
    %88 = arith.divf %86, %87 : vector<2x32xf32>
    %89 = vector.extract_strided_slice %76 {offsets = [0, 64], sizes = [2, 32], strides = [1, 1]} : vector<2x128xf32> to vector<2x32xf32>
    %90 = math.tanh %89 : vector<2x32xf32>
    %91 = vector.extract_strided_slice %76 {offsets = [0, 96], sizes = [2, 32], strides = [1, 1]} : vector<2x128xf32> to vector<2x32xf32>
    %92 = arith.negf %91 : vector<2x32xf32>
    %93 = math.exp %92 : vector<2x32xf32>
    %cst_30 = arith.constant 1.000000e+00 : f32
    %94 = vector.broadcast %cst_30 : f32 to vector<2x32xf32>
    %95 = arith.addf %94, %93 : vector<2x32xf32>
    %96 = arith.divf %94, %95 : vector<2x32xf32>
    %97 = arith.mulf %88, %69 : vector<2x32xf32>
    %98 = arith.mulf %82, %90 : vector<2x32xf32>
    %99 = arith.addf %97, %98 : vector<2x32xf32>
    %100 = math.tanh %99 : vector<2x32xf32>
    %101 = arith.mulf %96, %100 : vector<2x32xf32>
    %c4_31 = arith.constant 4 : index
    %c0_32 = arith.constant 0 : index
    %102 = vector.load %arg11[%c4_31, %c0_32] : memref<16x32xf32, #tpu.memory_space<vmem>>, vector<2x32xf32>
    tpu.vector_store %arg11[%c4_31, %c0_32], %101 {strides = array<i32>} : memref<16x32xf32, #tpu.memory_space<vmem>>, vector<2x32xf32>,
    %c6 = arith.constant 6 : index
    %c0_33 = arith.constant 0 : index
    %103 = vector.load %arg10[%c6, %c0_33] : memref<16x128xf32, #tpu.memory_space<vmem>>, vector<2x128xf32>
    %104 = arith.truncf %101 : vector<2x32xf32> to vector<2x32xbf16>
    %cst_34 = arith.constant dense<0.000000e+00> : vector<2x128xf32>
    %105 = tpu.matmul %104, %10, %cst_34 {dimension_numbers = #tpu.dot_dimension_numbers<[1], [0], [0], [1], [0, 0, 1, 1], [], []>} : vector<2x32xbf16>, vector<32x128xbf16>, vector<2x128xf32> -> vector<2x128xf32>
    %106 = arith.addf %103, %105 : vector<2x128xf32>
    %107 = vector.extract_strided_slice %106 {offsets = [0, 0], sizes = [2, 32], strides = [1, 1]} : vector<2x128xf32> to vector<2x32xf32>
    %108 = arith.negf %107 : vector<2x32xf32>
    %109 = math.exp %108 : vector<2x32xf32>
    %cst_35 = arith.constant 1.000000e+00 : f32
    %110 = vector.broadcast %cst_35 : f32 to vector<2x32xf32>
    %111 = arith.addf %110, %109 : vector<2x32xf32>
    %112 = arith.divf %110, %111 : vector<2x32xf32>
    %113 = vector.extract_strided_slice %106 {offsets = [0, 32], sizes = [2, 32], strides = [1, 1]} : vector<2x128xf32> to vector<2x32xf32>
    %114 = arith.negf %113 : vector<2x32xf32>
    %115 = math.exp %114 : vector<2x32xf32>
    %cst_36 = arith.constant 1.000000e+00 : f32
    %116 = vector.broadcast %cst_36 : f32 to vector<2x32xf32>
    %117 = arith.addf %116, %115 : vector<2x32xf32>
    %118 = arith.divf %116, %117 : vector<2x32xf32>
    %119 = vector.extract_strided_slice %106 {offsets = [0, 64], sizes = [2, 32], strides = [1, 1]} : vector<2x128xf32> to vector<2x32xf32>
    %120 = math.tanh %119 : vector<2x32xf32>
    %121 = vector.extract_strided_slice %106 {offsets = [0, 96], sizes = [2, 32], strides = [1, 1]} : vector<2x128xf32> to vector<2x32xf32>
    %122 = arith.negf %121 : vector<2x32xf32>
    %123 = math.exp %122 : vector<2x32xf32>
    %cst_37 = arith.constant 1.000000e+00 : f32
    %124 = vector.broadcast %cst_37 : f32 to vector<2x32xf32>
    %125 = arith.addf %124, %123 : vector<2x32xf32>
    %126 = arith.divf %124, %125 : vector<2x32xf32>
    %127 = arith.mulf %118, %99 : vector<2x32xf32>
    %128 = arith.mulf %112, %120 : vector<2x32xf32>
    %129 = arith.addf %127, %128 : vector<2x32xf32>
    %130 = math.tanh %129 : vector<2x32xf32>
    %131 = arith.mulf %126, %130 : vector<2x32xf32>
    %c6_38 = arith.constant 6 : index
    %c0_39 = arith.constant 0 : index
    %132 = vector.load %arg11[%c6_38, %c0_39] : memref<16x32xf32, #tpu.memory_space<vmem>>, vector<2x32xf32>
    tpu.vector_store %arg11[%c6_38, %c0_39], %131 {strides = array<i32>} : memref<16x32xf32, #tpu.memory_space<vmem>>, vector<2x32xf32>,
    %c8 = arith.constant 8 : index
    %c0_40 = arith.constant 0 : index
    %133 = vector.load %arg10[%c8, %c0_40] : memref<16x128xf32, #tpu.memory_space<vmem>>, vector<2x128xf32>
    %134 = arith.truncf %131 : vector<2x32xf32> to vector<2x32xbf16>
    %cst_41 = arith.constant dense<0.000000e+00> : vector<2x128xf32>
    %135 = tpu.matmul %134, %10, %cst_41 {dimension_numbers = #tpu.dot_dimension_numbers<[1], [0], [0], [1], [0, 0, 1, 1], [], []>} : vector<2x32xbf16>, vector<32x128xbf16>, vector<2x128xf32> -> vector<2x128xf32>
    %136 = arith.addf %133, %135 : vector<2x128xf32>
    %137 = vector.extract_strided_slice %136 {offsets = [0, 0], sizes = [2, 32], strides = [1, 1]} : vector<2x128xf32> to vector<2x32xf32>
    %138 = arith.negf %137 : vector<2x32xf32>
    %139 = math.exp %138 : vector<2x32xf32>
    %cst_42 = arith.constant 1.000000e+00 : f32
    %140 = vector.broadcast %cst_42 : f32 to vector<2x32xf32>
    %141 = arith.addf %140, %139 : vector<2x32xf32>
    %142 = arith.divf %140, %141 : vector<2x32xf32>
    %143 = vector.extract_strided_slice %136 {offsets = [0, 32], sizes = [2, 32], strides = [1, 1]} : vector<2x128xf32> to vector<2x32xf32>
    %144 = arith.negf %143 : vector<2x32xf32>
    %145 = math.exp %144 : vector<2x32xf32>
    %cst_43 = arith.constant 1.000000e+00 : f32
    %146 = vector.broadcast %cst_43 : f32 to vector<2x32xf32>
    %147 = arith.addf %146, %145 : vector<2x32xf32>
    %148 = arith.divf %146, %147 : vector<2x32xf32>
    %149 = vector.extract_strided_slice %136 {offsets = [0, 64], sizes = [2, 32], strides = [1, 1]} : vector<2x128xf32> to vector<2x32xf32>
    %150 = math.tanh %149 : vector<2x32xf32>
    %151 = vector.extract_strided_slice %136 {offsets = [0, 96], sizes = [2, 32], strides = [1, 1]} : vector<2x128xf32> to vector<2x32xf32>
    %152 = arith.negf %151 : vector<2x32xf32>
    %153 = math.exp %152 : vector<2x32xf32>
    %cst_44 = arith.constant 1.000000e+00 : f32
    %154 = vector.broadcast %cst_44 : f32 to vector<2x32xf32>
    %155 = arith.addf %154, %153 : vector<2x32xf32>
    %156 = arith.divf %154, %155 : vector<2x32xf32>
    %157 = arith.mulf %148, %129 : vector<2x32xf32>
    %158 = arith.mulf %142, %150 : vector<2x32xf32>
    %159 = arith.addf %157, %158 : vector<2x32xf32>
    %160 = math.tanh %159 : vector<2x32xf32>
    %161 = arith.mulf %156, %160 : vector<2x32xf32>
    %c8_45 = arith.constant 8 : index
    %c0_46 = arith.constant 0 : index
    %162 = vector.load %arg11[%c8_45, %c0_46] : memref<16x32xf32, #tpu.memory_space<vmem>>, vector<2x32xf32>
    tpu.vector_store %arg11[%c8_45, %c0_46], %161 {strides = array<i32>} : memref<16x32xf32, #tpu.memory_space<vmem>>, vector<2x32xf32>,
    %c10 = arith.constant 10 : index
    %c0_47 = arith.constant 0 : index
    %163 = vector.load %arg10[%c10, %c0_47] : memref<16x128xf32, #tpu.memory_space<vmem>>, vector<2x128xf32>
    %164 = arith.truncf %161 : vector<2x32xf32> to vector<2x32xbf16>
    %cst_48 = arith.constant dense<0.000000e+00> : vector<2x128xf32>
    %165 = tpu.matmul %164, %10, %cst_48 {dimension_numbers = #tpu.dot_dimension_numbers<[1], [0], [0], [1], [0, 0, 1, 1], [], []>} : vector<2x32xbf16>, vector<32x128xbf16>, vector<2x128xf32> -> vector<2x128xf32>
    %166 = arith.addf %163, %165 : vector<2x128xf32>
    %167 = vector.extract_strided_slice %166 {offsets = [0, 0], sizes = [2, 32], strides = [1, 1]} : vector<2x128xf32> to vector<2x32xf32>
    %168 = arith.negf %167 : vector<2x32xf32>
    %169 = math.exp %168 : vector<2x32xf32>
    %cst_49 = arith.constant 1.000000e+00 : f32
    %170 = vector.broadcast %cst_49 : f32 to vector<2x32xf32>
    %171 = arith.addf %170, %169 : vector<2x32xf32>
    %172 = arith.divf %170, %171 : vector<2x32xf32>
    %173 = vector.extract_strided_slice %166 {offsets = [0, 32], sizes = [2, 32], strides = [1, 1]} : vector<2x128xf32> to vector<2x32xf32>
    %174 = arith.negf %173 : vector<2x32xf32>
    %175 = math.exp %174 : vector<2x32xf32>
    %cst_50 = arith.constant 1.000000e+00 : f32
    %176 = vector.broadcast %cst_50 : f32 to vector<2x32xf32>
    %177 = arith.addf %176, %175 : vector<2x32xf32>
    %178 = arith.divf %176, %177 : vector<2x32xf32>
    %179 = vector.extract_strided_slice %166 {offsets = [0, 64], sizes = [2, 32], strides = [1, 1]} : vector<2x128xf32> to vector<2x32xf32>
    %180 = math.tanh %179 : vector<2x32xf32>
    %181 = vector.extract_strided_slice %166 {offsets = [0, 96], sizes = [2, 32], strides = [1, 1]} : vector<2x128xf32> to vector<2x32xf32>
    %182 = arith.negf %181 : vector<2x32xf32>
    %183 = math.exp %182 : vector<2x32xf32>
    %cst_51 = arith.constant 1.000000e+00 : f32
    %184 = vector.broadcast %cst_51 : f32 to vector<2x32xf32>
    %185 = arith.addf %184, %183 : vector<2x32xf32>
    %186 = arith.divf %184, %185 : vector<2x32xf32>
    %187 = arith.mulf %178, %159 : vector<2x32xf32>
    %188 = arith.mulf %172, %180 : vector<2x32xf32>
    %189 = arith.addf %187, %188 : vector<2x32xf32>
    %190 = math.tanh %189 : vector<2x32xf32>
    %191 = arith.mulf %186, %190 : vector<2x32xf32>
    %c10_52 = arith.constant 10 : index
    %c0_53 = arith.constant 0 : index
    %192 = vector.load %arg11[%c10_52, %c0_53] : memref<16x32xf32, #tpu.memory_space<vmem>>, vector<2x32xf32>
    tpu.vector_store %arg11[%c10_52, %c0_53], %191 {strides = array<i32>} : memref<16x32xf32, #tpu.memory_space<vmem>>, vector<2x32xf32>,
    %c12 = arith.constant 12 : index
    %c0_54 = arith.constant 0 : index
    %193 = vector.load %arg10[%c12, %c0_54] : memref<16x128xf32, #tpu.memory_space<vmem>>, vector<2x128xf32>
    %194 = arith.truncf %191 : vector<2x32xf32> to vector<2x32xbf16>
    %cst_55 = arith.constant dense<0.000000e+00> : vector<2x128xf32>
    %195 = tpu.matmul %194, %10, %cst_55 {dimension_numbers = #tpu.dot_dimension_numbers<[1], [0], [0], [1], [0, 0, 1, 1], [], []>} : vector<2x32xbf16>, vector<32x128xbf16>, vector<2x128xf32> -> vector<2x128xf32>
    %196 = arith.addf %193, %195 : vector<2x128xf32>
    %197 = vector.extract_strided_slice %196 {offsets = [0, 0], sizes = [2, 32], strides = [1, 1]} : vector<2x128xf32> to vector<2x32xf32>
    %198 = arith.negf %197 : vector<2x32xf32>
    %199 = math.exp %198 : vector<2x32xf32>
    %cst_56 = arith.constant 1.000000e+00 : f32
    %200 = vector.broadcast %cst_56 : f32 to vector<2x32xf32>
    %201 = arith.addf %200, %199 : vector<2x32xf32>
    %202 = arith.divf %200, %201 : vector<2x32xf32>
    %203 = vector.extract_strided_slice %196 {offsets = [0, 32], sizes = [2, 32], strides = [1, 1]} : vector<2x128xf32> to vector<2x32xf32>
    %204 = arith.negf %203 : vector<2x32xf32>
    %205 = math.exp %204 : vector<2x32xf32>
    %cst_57 = arith.constant 1.000000e+00 : f32
    %206 = vector.broadcast %cst_57 : f32 to vector<2x32xf32>
    %207 = arith.addf %206, %205 : vector<2x32xf32>
    %208 = arith.divf %206, %207 : vector<2x32xf32>
    %209 = vector.extract_strided_slice %196 {offsets = [0, 64], sizes = [2, 32], strides = [1, 1]} : vector<2x128xf32> to vector<2x32xf32>
    %210 = math.tanh %209 : vector<2x32xf32>
    %211 = vector.extract_strided_slice %196 {offsets = [0, 96], sizes = [2, 32], strides = [1, 1]} : vector<2x128xf32> to vector<2x32xf32>
    %212 = arith.negf %211 : vector<2x32xf32>
    %213 = math.exp %212 : vector<2x32xf32>
    %cst_58 = arith.constant 1.000000e+00 : f32
    %214 = vector.broadcast %cst_58 : f32 to vector<2x32xf32>
    %215 = arith.addf %214, %213 : vector<2x32xf32>
    %216 = arith.divf %214, %215 : vector<2x32xf32>
    %217 = arith.mulf %208, %189 : vector<2x32xf32>
    %218 = arith.mulf %202, %210 : vector<2x32xf32>
    %219 = arith.addf %217, %218 : vector<2x32xf32>
    %220 = math.tanh %219 : vector<2x32xf32>
    %221 = arith.mulf %216, %220 : vector<2x32xf32>
    %c12_59 = arith.constant 12 : index
    %c0_60 = arith.constant 0 : index
    %222 = vector.load %arg11[%c12_59, %c0_60] : memref<16x32xf32, #tpu.memory_space<vmem>>, vector<2x32xf32>
    tpu.vector_store %arg11[%c12_59, %c0_60], %221 {strides = array<i32>} : memref<16x32xf32, #tpu.memory_space<vmem>>, vector<2x32xf32>,
    %c14 = arith.constant 14 : index
    %c0_61 = arith.constant 0 : index
    %223 = vector.load %arg10[%c14, %c0_61] : memref<16x128xf32, #tpu.memory_space<vmem>>, vector<2x128xf32>
    %224 = arith.truncf %221 : vector<2x32xf32> to vector<2x32xbf16>
    %cst_62 = arith.constant dense<0.000000e+00> : vector<2x128xf32>
    %225 = tpu.matmul %224, %10, %cst_62 {dimension_numbers = #tpu.dot_dimension_numbers<[1], [0], [0], [1], [0, 0, 1, 1], [], []>} : vector<2x32xbf16>, vector<32x128xbf16>, vector<2x128xf32> -> vector<2x128xf32>
    %226 = arith.addf %223, %225 : vector<2x128xf32>
    %227 = vector.extract_strided_slice %226 {offsets = [0, 0], sizes = [2, 32], strides = [1, 1]} : vector<2x128xf32> to vector<2x32xf32>
    %228 = arith.negf %227 : vector<2x32xf32>
    %229 = math.exp %228 : vector<2x32xf32>
    %cst_63 = arith.constant 1.000000e+00 : f32
    %230 = vector.broadcast %cst_63 : f32 to vector<2x32xf32>
    %231 = arith.addf %230, %229 : vector<2x32xf32>
    %232 = arith.divf %230, %231 : vector<2x32xf32>
    %233 = vector.extract_strided_slice %226 {offsets = [0, 32], sizes = [2, 32], strides = [1, 1]} : vector<2x128xf32> to vector<2x32xf32>
    %234 = arith.negf %233 : vector<2x32xf32>
    %235 = math.exp %234 : vector<2x32xf32>
    %cst_64 = arith.constant 1.000000e+00 : f32
    %236 = vector.broadcast %cst_64 : f32 to vector<2x32xf32>
    %237 = arith.addf %236, %235 : vector<2x32xf32>
    %238 = arith.divf %236, %237 : vector<2x32xf32>
    %239 = vector.extract_strided_slice %226 {offsets = [0, 64], sizes = [2, 32], strides = [1, 1]} : vector<2x128xf32> to vector<2x32xf32>
    %240 = math.tanh %239 : vector<2x32xf32>
    %241 = vector.extract_strided_slice %226 {offsets = [0, 96], sizes = [2, 32], strides = [1, 1]} : vector<2x128xf32> to vector<2x32xf32>
    %242 = arith.negf %241 : vector<2x32xf32>
    %243 = math.exp %242 : vector<2x32xf32>
    %cst_65 = arith.constant 1.000000e+00 : f32
    %244 = vector.broadcast %cst_65 : f32 to vector<2x32xf32>
    %245 = arith.addf %244, %243 : vector<2x32xf32>
    %246 = arith.divf %244, %245 : vector<2x32xf32>
    %247 = arith.mulf %238, %219 : vector<2x32xf32>
    %248 = arith.mulf %232, %240 : vector<2x32xf32>
    %249 = arith.addf %247, %248 : vector<2x32xf32>
    %250 = math.tanh %249 : vector<2x32xf32>
    %251 = arith.mulf %246, %250 : vector<2x32xf32>
    %c14_66 = arith.constant 14 : index
    %c0_67 = arith.constant 0 : index
    %252 = vector.load %arg11[%c14_66, %c0_67] : memref<16x32xf32, #tpu.memory_space<vmem>>, vector<2x32xf32>
    tpu.vector_store %arg11[%c14_66, %c0_67], %251 {strides = array<i32>} : memref<16x32xf32, #tpu.memory_space<vmem>>, vector<2x32xf32>,
    %c0_68 = arith.constant 0 : index
    %c0_69 = arith.constant 0 : index
    %253 = vector.load %arg11[%c0_68, %c0_69] : memref<16x32xf32, #tpu.memory_space<vmem>>, vector<16x32xf32>
    %254 = arith.truncf %253 : vector<16x32xf32> to vector<16x32xbf16>
    %c0_70 = arith.constant 0 : index
    %c0_71 = arith.constant 0 : index
    %255 = vector.load %arg4[%c0_70, %c0_71] : memref<32x128xf32, #tpu.memory_space<vmem>>, vector<32x128xf32>
    %256 = arith.truncf %255 : vector<32x128xf32> to vector<32x128xbf16>
    %cst_72 = arith.constant dense<0.000000e+00> : vector<16x128xf32>
    %257 = tpu.matmul %254, %256, %cst_72 {dimension_numbers = #tpu.dot_dimension_numbers<[1], [0], [0], [1], [0, 0, 1, 1], [], []>} : vector<16x32xbf16>, vector<32x128xbf16>, vector<16x128xf32> -> vector<16x128xf32>
    %c0_73 = arith.constant 0 : index
    %c0_74 = arith.constant 0 : index
    %258 = vector.load %arg6[%c0_73, %c0_74] : memref<1x128xf32, #tpu.memory_space<vmem>>, vector<1x128xf32>
    %259 = vector.broadcast %258 : vector<1x128xf32> to vector<16x128xf32>
    %260 = arith.addf %257, %259 : vector<16x128xf32>
    %c0_75 = arith.constant 0 : index
    %c0_76 = arith.constant 0 : index
    %261 = vector.load %arg10[%c0_75, %c0_76] : memref<16x128xf32, #tpu.memory_space<vmem>>, vector<16x128xf32>
    tpu.vector_store %arg10[%c0_75, %c0_76], %260 {strides = array<i32>} : memref<16x128xf32, #tpu.memory_space<vmem>>, vector<16x128xf32>,
    %c0_77 = arith.constant 0 : index
    %c0_78 = arith.constant 0 : index
    %262 = vector.load %arg5[%c0_77, %c0_78] : memref<32x128xf32, #tpu.memory_space<vmem>>, vector<32x128xf32>
    %263 = arith.truncf %262 : vector<32x128xf32> to vector<32x128xbf16>
    %cst_79 = arith.constant 0.000000e+00 : f32
    %264 = vector.broadcast %cst_79 : f32 to vector<2x32xf32>
    %cst_80 = arith.constant 0.000000e+00 : f32
    %265 = vector.broadcast %cst_80 : f32 to vector<2x32xf32>
    %c0_81 = arith.constant 0 : index
    %c0_82 = arith.constant 0 : index
    %266 = vector.load %arg10[%c0_81, %c0_82] : memref<16x128xf32, #tpu.memory_space<vmem>>, vector<2x128xf32>
    %267 = arith.truncf %264 : vector<2x32xf32> to vector<2x32xbf16>
    %cst_83 = arith.constant dense<0.000000e+00> : vector<2x128xf32>
    %268 = tpu.matmul %267, %263, %cst_83 {dimension_numbers = #tpu.dot_dimension_numbers<[1], [0], [0], [1], [0, 0, 1, 1], [], []>} : vector<2x32xbf16>, vector<32x128xbf16>, vector<2x128xf32> -> vector<2x128xf32>
    %269 = arith.addf %266, %268 : vector<2x128xf32>
    %270 = vector.extract_strided_slice %269 {offsets = [0, 0], sizes = [2, 32], strides = [1, 1]} : vector<2x128xf32> to vector<2x32xf32>
    %271 = arith.negf %270 : vector<2x32xf32>
    %272 = math.exp %271 : vector<2x32xf32>
    %cst_84 = arith.constant 1.000000e+00 : f32
    %273 = vector.broadcast %cst_84 : f32 to vector<2x32xf32>
    %274 = arith.addf %273, %272 : vector<2x32xf32>
    %275 = arith.divf %273, %274 : vector<2x32xf32>
    %276 = vector.extract_strided_slice %269 {offsets = [0, 32], sizes = [2, 32], strides = [1, 1]} : vector<2x128xf32> to vector<2x32xf32>
    %277 = arith.negf %276 : vector<2x32xf32>
    %278 = math.exp %277 : vector<2x32xf32>
    %cst_85 = arith.constant 1.000000e+00 : f32
    %279 = vector.broadcast %cst_85 : f32 to vector<2x32xf32>
    %280 = arith.addf %279, %278 : vector<2x32xf32>
    %281 = arith.divf %279, %280 : vector<2x32xf32>
    %282 = vector.extract_strided_slice %269 {offsets = [0, 64], sizes = [2, 32], strides = [1, 1]} : vector<2x128xf32> to vector<2x32xf32>
    %283 = math.tanh %282 : vector<2x32xf32>
    %284 = vector.extract_strided_slice %269 {offsets = [0, 96], sizes = [2, 32], strides = [1, 1]} : vector<2x128xf32> to vector<2x32xf32>
    %285 = arith.negf %284 : vector<2x32xf32>
    %286 = math.exp %285 : vector<2x32xf32>
    %cst_86 = arith.constant 1.000000e+00 : f32
    %287 = vector.broadcast %cst_86 : f32 to vector<2x32xf32>
    %288 = arith.addf %287, %286 : vector<2x32xf32>
    %289 = arith.divf %287, %288 : vector<2x32xf32>
    %290 = arith.mulf %281, %265 : vector<2x32xf32>
    %291 = arith.mulf %275, %283 : vector<2x32xf32>
    %292 = arith.addf %290, %291 : vector<2x32xf32>
    %293 = math.tanh %292 : vector<2x32xf32>
    %294 = arith.mulf %289, %293 : vector<2x32xf32>
    %c2_87 = arith.constant 2 : index
    %c0_88 = arith.constant 0 : index
    %295 = vector.load %arg10[%c2_87, %c0_88] : memref<16x128xf32, #tpu.memory_space<vmem>>, vector<2x128xf32>
    %296 = arith.truncf %294 : vector<2x32xf32> to vector<2x32xbf16>
    %cst_89 = arith.constant dense<0.000000e+00> : vector<2x128xf32>
    %297 = tpu.matmul %296, %263, %cst_89 {dimension_numbers = #tpu.dot_dimension_numbers<[1], [0], [0], [1], [0, 0, 1, 1], [], []>} : vector<2x32xbf16>, vector<32x128xbf16>, vector<2x128xf32> -> vector<2x128xf32>
    %298 = arith.addf %295, %297 : vector<2x128xf32>
    %299 = vector.extract_strided_slice %298 {offsets = [0, 0], sizes = [2, 32], strides = [1, 1]} : vector<2x128xf32> to vector<2x32xf32>
    %300 = arith.negf %299 : vector<2x32xf32>
    %301 = math.exp %300 : vector<2x32xf32>
    %cst_90 = arith.constant 1.000000e+00 : f32
    %302 = vector.broadcast %cst_90 : f32 to vector<2x32xf32>
    %303 = arith.addf %302, %301 : vector<2x32xf32>
    %304 = arith.divf %302, %303 : vector<2x32xf32>
    %305 = vector.extract_strided_slice %298 {offsets = [0, 32], sizes = [2, 32], strides = [1, 1]} : vector<2x128xf32> to vector<2x32xf32>
    %306 = arith.negf %305 : vector<2x32xf32>
    %307 = math.exp %306 : vector<2x32xf32>
    %cst_91 = arith.constant 1.000000e+00 : f32
    %308 = vector.broadcast %cst_91 : f32 to vector<2x32xf32>
    %309 = arith.addf %308, %307 : vector<2x32xf32>
    %310 = arith.divf %308, %309 : vector<2x32xf32>
    %311 = vector.extract_strided_slice %298 {offsets = [0, 64], sizes = [2, 32], strides = [1, 1]} : vector<2x128xf32> to vector<2x32xf32>
    %312 = math.tanh %311 : vector<2x32xf32>
    %313 = vector.extract_strided_slice %298 {offsets = [0, 96], sizes = [2, 32], strides = [1, 1]} : vector<2x128xf32> to vector<2x32xf32>
    %314 = arith.negf %313 : vector<2x32xf32>
    %315 = math.exp %314 : vector<2x32xf32>
    %cst_92 = arith.constant 1.000000e+00 : f32
    %316 = vector.broadcast %cst_92 : f32 to vector<2x32xf32>
    %317 = arith.addf %316, %315 : vector<2x32xf32>
    %318 = arith.divf %316, %317 : vector<2x32xf32>
    %319 = arith.mulf %310, %292 : vector<2x32xf32>
    %320 = arith.mulf %304, %312 : vector<2x32xf32>
    %321 = arith.addf %319, %320 : vector<2x32xf32>
    %322 = math.tanh %321 : vector<2x32xf32>
    %323 = arith.mulf %318, %322 : vector<2x32xf32>
    %c4_93 = arith.constant 4 : index
    %c0_94 = arith.constant 0 : index
    %324 = vector.load %arg10[%c4_93, %c0_94] : memref<16x128xf32, #tpu.memory_space<vmem>>, vector<2x128xf32>
    %325 = arith.truncf %323 : vector<2x32xf32> to vector<2x32xbf16>
    %cst_95 = arith.constant dense<0.000000e+00> : vector<2x128xf32>
    %326 = tpu.matmul %325, %263, %cst_95 {dimension_numbers = #tpu.dot_dimension_numbers<[1], [0], [0], [1], [0, 0, 1, 1], [], []>} : vector<2x32xbf16>, vector<32x128xbf16>, vector<2x128xf32> -> vector<2x128xf32>
    %327 = arith.addf %324, %326 : vector<2x128xf32>
    %328 = vector.extract_strided_slice %327 {offsets = [0, 0], sizes = [2, 32], strides = [1, 1]} : vector<2x128xf32> to vector<2x32xf32>
    %329 = arith.negf %328 : vector<2x32xf32>
    %330 = math.exp %329 : vector<2x32xf32>
    %cst_96 = arith.constant 1.000000e+00 : f32
    %331 = vector.broadcast %cst_96 : f32 to vector<2x32xf32>
    %332 = arith.addf %331, %330 : vector<2x32xf32>
    %333 = arith.divf %331, %332 : vector<2x32xf32>
    %334 = vector.extract_strided_slice %327 {offsets = [0, 32], sizes = [2, 32], strides = [1, 1]} : vector<2x128xf32> to vector<2x32xf32>
    %335 = arith.negf %334 : vector<2x32xf32>
    %336 = math.exp %335 : vector<2x32xf32>
    %cst_97 = arith.constant 1.000000e+00 : f32
    %337 = vector.broadcast %cst_97 : f32 to vector<2x32xf32>
    %338 = arith.addf %337, %336 : vector<2x32xf32>
    %339 = arith.divf %337, %338 : vector<2x32xf32>
    %340 = vector.extract_strided_slice %327 {offsets = [0, 64], sizes = [2, 32], strides = [1, 1]} : vector<2x128xf32> to vector<2x32xf32>
    %341 = math.tanh %340 : vector<2x32xf32>
    %342 = vector.extract_strided_slice %327 {offsets = [0, 96], sizes = [2, 32], strides = [1, 1]} : vector<2x128xf32> to vector<2x32xf32>
    %343 = arith.negf %342 : vector<2x32xf32>
    %344 = math.exp %343 : vector<2x32xf32>
    %cst_98 = arith.constant 1.000000e+00 : f32
    %345 = vector.broadcast %cst_98 : f32 to vector<2x32xf32>
    %346 = arith.addf %345, %344 : vector<2x32xf32>
    %347 = arith.divf %345, %346 : vector<2x32xf32>
    %348 = arith.mulf %339, %321 : vector<2x32xf32>
    %349 = arith.mulf %333, %341 : vector<2x32xf32>
    %350 = arith.addf %348, %349 : vector<2x32xf32>
    %351 = math.tanh %350 : vector<2x32xf32>
    %352 = arith.mulf %347, %351 : vector<2x32xf32>
    %c6_99 = arith.constant 6 : index
    %c0_100 = arith.constant 0 : index
    %353 = vector.load %arg10[%c6_99, %c0_100] : memref<16x128xf32, #tpu.memory_space<vmem>>, vector<2x128xf32>
    %354 = arith.truncf %352 : vector<2x32xf32> to vector<2x32xbf16>
    %cst_101 = arith.constant dense<0.000000e+00> : vector<2x128xf32>
    %355 = tpu.matmul %354, %263, %cst_101 {dimension_numbers = #tpu.dot_dimension_numbers<[1], [0], [0], [1], [0, 0, 1, 1], [], []>} : vector<2x32xbf16>, vector<32x128xbf16>, vector<2x128xf32> -> vector<2x128xf32>
    %356 = arith.addf %353, %355 : vector<2x128xf32>
    %357 = vector.extract_strided_slice %356 {offsets = [0, 0], sizes = [2, 32], strides = [1, 1]} : vector<2x128xf32> to vector<2x32xf32>
    %358 = arith.negf %357 : vector<2x32xf32>
    %359 = math.exp %358 : vector<2x32xf32>
    %cst_102 = arith.constant 1.000000e+00 : f32
    %360 = vector.broadcast %cst_102 : f32 to vector<2x32xf32>
    %361 = arith.addf %360, %359 : vector<2x32xf32>
    %362 = arith.divf %360, %361 : vector<2x32xf32>
    %363 = vector.extract_strided_slice %356 {offsets = [0, 32], sizes = [2, 32], strides = [1, 1]} : vector<2x128xf32> to vector<2x32xf32>
    %364 = arith.negf %363 : vector<2x32xf32>
    %365 = math.exp %364 : vector<2x32xf32>
    %cst_103 = arith.constant 1.000000e+00 : f32
    %366 = vector.broadcast %cst_103 : f32 to vector<2x32xf32>
    %367 = arith.addf %366, %365 : vector<2x32xf32>
    %368 = arith.divf %366, %367 : vector<2x32xf32>
    %369 = vector.extract_strided_slice %356 {offsets = [0, 64], sizes = [2, 32], strides = [1, 1]} : vector<2x128xf32> to vector<2x32xf32>
    %370 = math.tanh %369 : vector<2x32xf32>
    %371 = vector.extract_strided_slice %356 {offsets = [0, 96], sizes = [2, 32], strides = [1, 1]} : vector<2x128xf32> to vector<2x32xf32>
    %372 = arith.negf %371 : vector<2x32xf32>
    %373 = math.exp %372 : vector<2x32xf32>
    %cst_104 = arith.constant 1.000000e+00 : f32
    %374 = vector.broadcast %cst_104 : f32 to vector<2x32xf32>
    %375 = arith.addf %374, %373 : vector<2x32xf32>
    %376 = arith.divf %374, %375 : vector<2x32xf32>
    %377 = arith.mulf %368, %350 : vector<2x32xf32>
    %378 = arith.mulf %362, %370 : vector<2x32xf32>
    %379 = arith.addf %377, %378 : vector<2x32xf32>
    %380 = math.tanh %379 : vector<2x32xf32>
    %381 = arith.mulf %376, %380 : vector<2x32xf32>
    %c8_105 = arith.constant 8 : index
    %c0_106 = arith.constant 0 : index
    %382 = vector.load %arg10[%c8_105, %c0_106] : memref<16x128xf32, #tpu.memory_space<vmem>>, vector<2x128xf32>
    %383 = arith.truncf %381 : vector<2x32xf32> to vector<2x32xbf16>
    %cst_107 = arith.constant dense<0.000000e+00> : vector<2x128xf32>
    %384 = tpu.matmul %383, %263, %cst_107 {dimension_numbers = #tpu.dot_dimension_numbers<[1], [0], [0], [1], [0, 0, 1, 1], [], []>} : vector<2x32xbf16>, vector<32x128xbf16>, vector<2x128xf32> -> vector<2x128xf32>
    %385 = arith.addf %382, %384 : vector<2x128xf32>
    %386 = vector.extract_strided_slice %385 {offsets = [0, 0], sizes = [2, 32], strides = [1, 1]} : vector<2x128xf32> to vector<2x32xf32>
    %387 = arith.negf %386 : vector<2x32xf32>
    %388 = math.exp %387 : vector<2x32xf32>
    %cst_108 = arith.constant 1.000000e+00 : f32
    %389 = vector.broadcast %cst_108 : f32 to vector<2x32xf32>
    %390 = arith.addf %389, %388 : vector<2x32xf32>
    %391 = arith.divf %389, %390 : vector<2x32xf32>
    %392 = vector.extract_strided_slice %385 {offsets = [0, 32], sizes = [2, 32], strides = [1, 1]} : vector<2x128xf32> to vector<2x32xf32>
    %393 = arith.negf %392 : vector<2x32xf32>
    %394 = math.exp %393 : vector<2x32xf32>
    %cst_109 = arith.constant 1.000000e+00 : f32
    %395 = vector.broadcast %cst_109 : f32 to vector<2x32xf32>
    %396 = arith.addf %395, %394 : vector<2x32xf32>
    %397 = arith.divf %395, %396 : vector<2x32xf32>
    %398 = vector.extract_strided_slice %385 {offsets = [0, 64], sizes = [2, 32], strides = [1, 1]} : vector<2x128xf32> to vector<2x32xf32>
    %399 = math.tanh %398 : vector<2x32xf32>
    %400 = vector.extract_strided_slice %385 {offsets = [0, 96], sizes = [2, 32], strides = [1, 1]} : vector<2x128xf32> to vector<2x32xf32>
    %401 = arith.negf %400 : vector<2x32xf32>
    %402 = math.exp %401 : vector<2x32xf32>
    %cst_110 = arith.constant 1.000000e+00 : f32
    %403 = vector.broadcast %cst_110 : f32 to vector<2x32xf32>
    %404 = arith.addf %403, %402 : vector<2x32xf32>
    %405 = arith.divf %403, %404 : vector<2x32xf32>
    %406 = arith.mulf %397, %379 : vector<2x32xf32>
    %407 = arith.mulf %391, %399 : vector<2x32xf32>
    %408 = arith.addf %406, %407 : vector<2x32xf32>
    %409 = math.tanh %408 : vector<2x32xf32>
    %410 = arith.mulf %405, %409 : vector<2x32xf32>
    %c10_111 = arith.constant 10 : index
    %c0_112 = arith.constant 0 : index
    %411 = vector.load %arg10[%c10_111, %c0_112] : memref<16x128xf32, #tpu.memory_space<vmem>>, vector<2x128xf32>
    %412 = arith.truncf %410 : vector<2x32xf32> to vector<2x32xbf16>
    %cst_113 = arith.constant dense<0.000000e+00> : vector<2x128xf32>
    %413 = tpu.matmul %412, %263, %cst_113 {dimension_numbers = #tpu.dot_dimension_numbers<[1], [0], [0], [1], [0, 0, 1, 1], [], []>} : vector<2x32xbf16>, vector<32x128xbf16>, vector<2x128xf32> -> vector<2x128xf32>
    %414 = arith.addf %411, %413 : vector<2x128xf32>
    %415 = vector.extract_strided_slice %414 {offsets = [0, 0], sizes = [2, 32], strides = [1, 1]} : vector<2x128xf32> to vector<2x32xf32>
    %416 = arith.negf %415 : vector<2x32xf32>
    %417 = math.exp %416 : vector<2x32xf32>
    %cst_114 = arith.constant 1.000000e+00 : f32
    %418 = vector.broadcast %cst_114 : f32 to vector<2x32xf32>
    %419 = arith.addf %418, %417 : vector<2x32xf32>
    %420 = arith.divf %418, %419 : vector<2x32xf32>
    %421 = vector.extract_strided_slice %414 {offsets = [0, 32], sizes = [2, 32], strides = [1, 1]} : vector<2x128xf32> to vector<2x32xf32>
    %422 = arith.negf %421 : vector<2x32xf32>
    %423 = math.exp %422 : vector<2x32xf32>
    %cst_115 = arith.constant 1.000000e+00 : f32
    %424 = vector.broadcast %cst_115 : f32 to vector<2x32xf32>
    %425 = arith.addf %424, %423 : vector<2x32xf32>
    %426 = arith.divf %424, %425 : vector<2x32xf32>
    %427 = vector.extract_strided_slice %414 {offsets = [0, 64], sizes = [2, 32], strides = [1, 1]} : vector<2x128xf32> to vector<2x32xf32>
    %428 = math.tanh %427 : vector<2x32xf32>
    %429 = vector.extract_strided_slice %414 {offsets = [0, 96], sizes = [2, 32], strides = [1, 1]} : vector<2x128xf32> to vector<2x32xf32>
    %430 = arith.negf %429 : vector<2x32xf32>
    %431 = math.exp %430 : vector<2x32xf32>
    %cst_116 = arith.constant 1.000000e+00 : f32
    %432 = vector.broadcast %cst_116 : f32 to vector<2x32xf32>
    %433 = arith.addf %432, %431 : vector<2x32xf32>
    %434 = arith.divf %432, %433 : vector<2x32xf32>
    %435 = arith.mulf %426, %408 : vector<2x32xf32>
    %436 = arith.mulf %420, %428 : vector<2x32xf32>
    %437 = arith.addf %435, %436 : vector<2x32xf32>
    %438 = math.tanh %437 : vector<2x32xf32>
    %439 = arith.mulf %434, %438 : vector<2x32xf32>
    %c12_117 = arith.constant 12 : index
    %c0_118 = arith.constant 0 : index
    %440 = vector.load %arg10[%c12_117, %c0_118] : memref<16x128xf32, #tpu.memory_space<vmem>>, vector<2x128xf32>
    %441 = arith.truncf %439 : vector<2x32xf32> to vector<2x32xbf16>
    %cst_119 = arith.constant dense<0.000000e+00> : vector<2x128xf32>
    %442 = tpu.matmul %441, %263, %cst_119 {dimension_numbers = #tpu.dot_dimension_numbers<[1], [0], [0], [1], [0, 0, 1, 1], [], []>} : vector<2x32xbf16>, vector<32x128xbf16>, vector<2x128xf32> -> vector<2x128xf32>
    %443 = arith.addf %440, %442 : vector<2x128xf32>
    %444 = vector.extract_strided_slice %443 {offsets = [0, 0], sizes = [2, 32], strides = [1, 1]} : vector<2x128xf32> to vector<2x32xf32>
    %445 = arith.negf %444 : vector<2x32xf32>
    %446 = math.exp %445 : vector<2x32xf32>
    %cst_120 = arith.constant 1.000000e+00 : f32
    %447 = vector.broadcast %cst_120 : f32 to vector<2x32xf32>
    %448 = arith.addf %447, %446 : vector<2x32xf32>
    %449 = arith.divf %447, %448 : vector<2x32xf32>
    %450 = vector.extract_strided_slice %443 {offsets = [0, 32], sizes = [2, 32], strides = [1, 1]} : vector<2x128xf32> to vector<2x32xf32>
    %451 = arith.negf %450 : vector<2x32xf32>
    %452 = math.exp %451 : vector<2x32xf32>
    %cst_121 = arith.constant 1.000000e+00 : f32
    %453 = vector.broadcast %cst_121 : f32 to vector<2x32xf32>
    %454 = arith.addf %453, %452 : vector<2x32xf32>
    %455 = arith.divf %453, %454 : vector<2x32xf32>
    %456 = vector.extract_strided_slice %443 {offsets = [0, 64], sizes = [2, 32], strides = [1, 1]} : vector<2x128xf32> to vector<2x32xf32>
    %457 = math.tanh %456 : vector<2x32xf32>
    %458 = vector.extract_strided_slice %443 {offsets = [0, 96], sizes = [2, 32], strides = [1, 1]} : vector<2x128xf32> to vector<2x32xf32>
    %459 = arith.negf %458 : vector<2x32xf32>
    %460 = math.exp %459 : vector<2x32xf32>
    %cst_122 = arith.constant 1.000000e+00 : f32
    %461 = vector.broadcast %cst_122 : f32 to vector<2x32xf32>
    %462 = arith.addf %461, %460 : vector<2x32xf32>
    %463 = arith.divf %461, %462 : vector<2x32xf32>
    %464 = arith.mulf %455, %437 : vector<2x32xf32>
    %465 = arith.mulf %449, %457 : vector<2x32xf32>
    %466 = arith.addf %464, %465 : vector<2x32xf32>
    %467 = math.tanh %466 : vector<2x32xf32>
    %468 = arith.mulf %463, %467 : vector<2x32xf32>
    %c14_123 = arith.constant 14 : index
    %c0_124 = arith.constant 0 : index
    %469 = vector.load %arg10[%c14_123, %c0_124] : memref<16x128xf32, #tpu.memory_space<vmem>>, vector<2x128xf32>
    %470 = arith.truncf %468 : vector<2x32xf32> to vector<2x32xbf16>
    %cst_125 = arith.constant dense<0.000000e+00> : vector<2x128xf32>
    %471 = tpu.matmul %470, %263, %cst_125 {dimension_numbers = #tpu.dot_dimension_numbers<[1], [0], [0], [1], [0, 0, 1, 1], [], []>} : vector<2x32xbf16>, vector<32x128xbf16>, vector<2x128xf32> -> vector<2x128xf32>
    %472 = arith.addf %469, %471 : vector<2x128xf32>
    %473 = vector.extract_strided_slice %472 {offsets = [0, 0], sizes = [2, 32], strides = [1, 1]} : vector<2x128xf32> to vector<2x32xf32>
    %474 = arith.negf %473 : vector<2x32xf32>
    %475 = math.exp %474 : vector<2x32xf32>
    %cst_126 = arith.constant 1.000000e+00 : f32
    %476 = vector.broadcast %cst_126 : f32 to vector<2x32xf32>
    %477 = arith.addf %476, %475 : vector<2x32xf32>
    %478 = arith.divf %476, %477 : vector<2x32xf32>
    %479 = vector.extract_strided_slice %472 {offsets = [0, 32], sizes = [2, 32], strides = [1, 1]} : vector<2x128xf32> to vector<2x32xf32>
    %480 = arith.negf %479 : vector<2x32xf32>
    %481 = math.exp %480 : vector<2x32xf32>
    %cst_127 = arith.constant 1.000000e+00 : f32
    %482 = vector.broadcast %cst_127 : f32 to vector<2x32xf32>
    %483 = arith.addf %482, %481 : vector<2x32xf32>
    %484 = arith.divf %482, %483 : vector<2x32xf32>
    %485 = vector.extract_strided_slice %472 {offsets = [0, 64], sizes = [2, 32], strides = [1, 1]} : vector<2x128xf32> to vector<2x32xf32>
    %486 = math.tanh %485 : vector<2x32xf32>
    %487 = vector.extract_strided_slice %472 {offsets = [0, 96], sizes = [2, 32], strides = [1, 1]} : vector<2x128xf32> to vector<2x32xf32>
    %488 = arith.negf %487 : vector<2x32xf32>
    %489 = math.exp %488 : vector<2x32xf32>
    %cst_128 = arith.constant 1.000000e+00 : f32
    %490 = vector.broadcast %cst_128 : f32 to vector<2x32xf32>
    %491 = arith.addf %490, %489 : vector<2x32xf32>
    %492 = arith.divf %490, %491 : vector<2x32xf32>
    %493 = arith.mulf %484, %466 : vector<2x32xf32>
    %494 = arith.mulf %478, %486 : vector<2x32xf32>
    %495 = arith.addf %493, %494 : vector<2x32xf32>
    %496 = math.tanh %495 : vector<2x32xf32>
    %497 = arith.mulf %492, %496 : vector<2x32xf32>
    %498 = arith.truncf %497 : vector<2x32xf32> to vector<2x32xbf16>
    %c0_129 = arith.constant 0 : index
    %c0_130 = arith.constant 0 : index
    %499 = vector.load %arg7[%c0_129, %c0_130] : memref<32x5xf32, #tpu.memory_space<vmem>>, vector<32x5xf32>
    %500 = arith.truncf %499 : vector<32x5xf32> to vector<32x5xbf16>
    %cst_131 = arith.constant dense<0.000000e+00> : vector<2x5xf32>
    %501 = tpu.matmul %498, %500, %cst_131 {dimension_numbers = #tpu.dot_dimension_numbers<[1], [0], [0], [1], [0, 0, 1, 1], [], []>} : vector<2x32xbf16>, vector<32x5xbf16>, vector<2x5xf32> -> vector<2x5xf32>
    %c0_132 = arith.constant 0 : index
    %c0_133 = arith.constant 0 : index
    %502 = vector.load %arg8[%c0_132, %c0_133] : memref<1x5xf32, #tpu.memory_space<vmem>>, vector<1x5xf32>
    %503 = vector.broadcast %502 : vector<1x5xf32> to vector<2x5xf32>
    %504 = arith.addf %501, %503 : vector<2x5xf32>
    %cst_134 = arith.constant dense<0xFF800000> : vector<2xf32>
    %505 = vector.multi_reduction <maximumf>, %504, %cst_134 [1] : vector<2x5xf32> to vector<2xf32>
    %506 = vector.shape_cast %505 : vector<2xf32> to vector<2x1xf32>
    %507 = vector.broadcast %506 : vector<2x1xf32> to vector<2x5xf32>
    %508 = arith.subf %504, %507 : vector<2x5xf32>
    %509 = math.exp %508 : vector<2x5xf32>
    %cst_135 = arith.constant dense<0.000000e+00> : vector<2xf32>
    %510 = vector.multi_reduction <add>, %509, %cst_135 [1] : vector<2x5xf32> to vector<2xf32>
    %511 = vector.shape_cast %510 : vector<2xf32> to vector<2x1xf32>
    %512 = vector.broadcast %511 : vector<2x1xf32> to vector<2x5xf32>
    %513 = arith.divf %509, %512 : vector<2x5xf32>
    %c0_136 = arith.constant 0 : index
    %c0_137 = arith.constant 0 : index
    %514 = vector.load %arg9[%c0_136, %c0_137] : memref<2x5xf32, #tpu.memory_space<vmem>>, vector<2x5xf32>
    tpu.vector_store %arg9[%c0_136, %c0_137], %513 {strides = array<i32>} : memref<2x5xf32, #tpu.memory_space<vmem>>, vector<2x5xf32>,
    return
  }
}

</mosaic_0001>

<bundles_post_ra>
// kernel: lstm_net_forward.1
= control target key start
LH: loop header
LB: loop body
LE: loop exit
PB: predicated region body
PF: predicated region fallthrough
CT: control target
= control target key end

     0   :  { %v1858_v3 = vmov 0.0   ;;  %vm1859_vm0 = vmmov 0   ;;  %vm47_vm1 = vcmask 130048   ;;  %s2240_s0 = inlined_call_operand.vmem [shape: f32[16,16], index: 0, kind: input, shape index: {}]   ;;  %s2241_s1 = inlined_call_operand.vmem [shape: f32[16,128], index: 1, kind: input, shape index: {}]   ;;  %s2242_s2 = inlined_call_operand.vmem [shape: f32[32,128], index: 2, kind: input, shape index: {}]   ;;  %s2243_s3 = inlined_call_operand.vmem [shape: f32[1,128], index: 3, kind: input, shape index: {}]   ;;  %s2244_s4 = inlined_call_operand.vmem [shape: f32[32,128], index: 4, kind: input, shape index: {}]   ;;  %s2245_s5 = inlined_call_operand.vmem [shape: f32[32,128], index: 5, kind: input, shape index: {}]   ;;  %s2246_s6 = inlined_call_operand.vmem [shape: f32[1,128], index: 6, kind: input, shape index: {}]   ;;  %s2247_s7 = inlined_call_operand.vmem [shape: f32[32,5], index: 7, kind: input, shape index: {}]   ;;  %s2248_s8 = inlined_call_operand.vmem [shape: f32[1,5], index: 8, kind: input, shape index: {}]   ;;  %s2249_s9 = inlined_call_operand.hbm [shape: f32[2,5], index: 9, kind: output, shape index: {}]  }
   0x1   :  { %v37_v0 = vld [vmem:[%s2241_s1] sm:$0xff]  ;;  %v38_v1 = vld [vmem:[%s2241_s1 + $0x8] sm:$0xff]  ;;  %1546 = vmatprep.subr.bf16.mxu0 %v1858_v3  ;;  %1548 = vmatprep.mubr.msk.bf16.mxu0 %vm1859_vm0, %v1858_v3  ;;  %v96_v10 = vld [vmem:[%s2242_s2 + $0x10] sm:$0xff] }
   0x2   :  { %v34_v2 = vld [vmem:[%s2240_s0] sm:$0xff]  ;;  %v39_v4 = vpack.c.bf16 %v38_v1, %v37_v0  ;;  %v35_v5 = vld [vmem:[%s2240_s0 + $0x8] sm:$0xff]  ;;  %1552 = vmatprep.subr.bf16.mxu1 %v1858_v3  ;;  %v97_v11 = vld [vmem:[%s2242_s2 + $0x18] sm:$0xff]  ;;  %1556 = vmatprep.mubr.msk.bf16.mxu1 %vm1859_vm0, %v1858_v3 }
   0x3   :  { %v94_v6 = vld [vmem:[%s2242_s2] sm:$0xff]  ;;  %v95_v7 = vld [vmem:[%s2242_s2 + $0x8] sm:$0xff]  ;;  %v36_v8 = vpack.c.bf16 %v35_v5, %v34_v2 }
   0x4   :  { %v1936_v9 = vpack.c.bf16 %v95_v7, %v94_v6  ;;  %1547 = vmatpush3.bf16.msra.mxu0 %v39_v4 }
   0x5   :  { %14 = vsyncpa [#allocation5], 0  ;;  %v1947_v12 = vpack.c.bf16 %v97_v11, %v96_v10  ;;  %1560 = vmatprep.subr.bf16.mxu0 %v1858_v3  ;;  %v1860_v13 = vmov 0   ;;  %v1454_v14 = vld [vmem:[%s2243_s3] ss:$0 sm:$0xff]  ;;  %s1861_s24 = smov 64  }
   0x6   :  { %1553 = vmatpush3.bf16.msra.mxu1 %v1936_v9  ;;  %s1862_s3 = smov 32   ;;  %vm101_vm2 = vcmask 261120   ;;  %vm174_vm3 = vcmask 254976   ;;  %vm1427_vm4 = vcmask 33792  }
   0x7   :  { %1554 = vmatprep.subr.bf16.mxu1 %v1858_v3  ;;  %1549 = vmatmul.mubr.msk.bf16.vlgmr.msra.gmra.mrb[0].mxu0 %vm47_vm1, %v36_v8 }
   0x8   :  { %1561 = vmatpush3.bf16.msra.mxu0 %v1936_v9  ;;  %1564 = vmatprep.mubr.msk.bf16.mxu0 %vm1859_vm0, %v1858_v3 }
   0x9   :  { %1562 = vmatprep.subr.bf16.mxu0 %v1858_v3 }
   0xa   :  { %1555 = vmatpush3.bf16.msra.mxu1 %v1947_v12 }
   0xb   :  { %1568 = vmatprep.subr.bf16.mxu1 %v1858_v3 }
   0xc   :  { %1563 = vmatpush3.bf16.msra.mxu0 %v1947_v12 }
   0xd   :  { %1557 = vmatmul.mubr.bf16.vlgmr.msra.gmra.mrb[0].mxu1 %v1860_v13  ;;  %1576 = vmatprep.subr.bf16.mxu0 %v1858_v3 }
   0xe   :  { %1569 = vmatpush3.bf16.msra.mxu1 %v1936_v9  ;;  %1572 = vmatprep.mubr.msk.bf16.mxu1 %vm1859_vm0, %v1858_v3 }
   0xf   :  { %1570 = vmatprep.subr.bf16.mxu1 %v1858_v3 }
  0x12   :  { %1571 = vmatpush3.bf16.msra.mxu1 %v1947_v12 }
  0x13   :  { %1584 = vmatprep.subr.bf16.mxu1 %v1858_v3 }
  0xda   :  { %v85_v15 = vpop.f32.mrb[0].mxu0 }
  0xdb   :  { %v86_v16 = vadd.f32 %v1454_v14, %v85_v15  ;;  %v1550_v17 = vpop.f32.mrb[1].mxu0 }
  0xdc   :  { %v88_v18 = vpop.f32.mrb[2].mxu0 }
  0xdd   :  { %92 = vst [vmem:[#allocation2] sm:$0xff] %v86_v16  ;;  %v89_v19 = vadd.f32 %v1454_v14, %v88_v18  ;;  %v1551_v20 = vpop.f32.mrb[3].mxu0 }
  0xdf   :  { %93 = vst [vmem:[#allocation2 + $0x8] sm:$0xff] %v89_v19 }
  0xe0   :  { %v139_v21 = vpop.f32.mrb[0].mxu1 }
  0xe1   :  { %v1558_v22 = vpop.f32.mrb[1].mxu1 }
  0xe2   :  { %v142_v23 = vpop.f32.mrb[2].mxu1 }
  0xe3   :  { %v1559_v24 = vpop.f32.mrb[3].mxu1 }
  0xe4   :  { %v100_v25 = vld [vmem:[#allocation2] sm:$0x3]  ;;  %v176_v42 = vld [vmem:[#allocation2 + $0x2] sm:$0x3]  ;;  %v254_v63 = vld [vmem:[#allocation2 + $0x4] sm:$0x3] }
  0xe5   :  { %v145_v26 = vadd.f32 %v139_v21, %v100_v25  ;;  %v332_v24 = vld [vmem:[#allocation2 + $0x6] sm:$0x3] }
  0xe7   :  { %1702 = vtanh.f32 %v145_v26  ;;  %v1456_v28 = vmul.f32 -1.442695, %v145_v26 }
  0xe9   :  { %1704 = vpow2.f32 %v1456_v28 }
  0xf1   :  { %v1703_v27 = vpop.eup %1702 }
  0xf2   :  { %155 = vrot.lane.b32.xlu0 %v1703_v27, %s1861_s24 }
  0xf3   :  { %v1705_v29 = vpop.eup %1704 }
  0xf4   :  { %v149_v30 = vadd.f32 1.0, %v1705_v29 }
  0xf6   :  { %1706 = vrcp.f32 %v149_v30 }
 0x100   :  { %v1707_v31 = vpop.eup %1706 }
 0x101   :  { %v153_v34 = vmul.f32 0.0, %v1707_v31 }
 0x164   :  { %v156_v32 = vpop.permute.xlu0 %155 }
 0x165   :  { %v158_v33 = vmul.f32 %v1707_v31, %v156_v32 }
 0x167   :  { %160 = vrot.lane.b32.xlu0 %v158_v33, %s1862_s3 }
 0x1d9   :  { %v161_v35 = vpop.permute.xlu0 %160 }
 0x1da   :  { %v163_v36 = vadd.f32 %v161_v35, %v153_v34 }
 0x1dc   :  { %1708 = vtanh.f32 %v163_v36 }
 0x1e6   :  { %v1709_v37 = vpop.eup %1708 }
 0x1e7   :  { %166 = vrot.lane.b32.xlu1 %v1709_v37, %s1861_s24 }
 0x259   :  { %v167_v38 = vpop.permute.xlu1 %166 }
 0x25a   :  { %v1972_v39 = vmul.f32 %v1707_v31, %v167_v38 }
 0x25c   :  { %v177_v40 = vpack.c.bf16 %v1972_v39, %v1972_v39 }
 0x25e   :  { %179 = vrot.lane.b32.xlu1 %v177_v40, %s1862_s3 }
 0x2d0   :  { %v180_v41 = vpop.permute.xlu1 %179 }
 0x2d1   :  { %1565 = vmatmul.mubr.msk.bf16.vlgmr.msra.gmra.mrb[4].mxu0 %vm101_vm2, %v180_v41 }
 0x2d2   :  { %1577 = vmatpush3.bf16.msra.mxu0 %v1936_v9  ;;  %1580 = vmatprep.mubr.msk.bf16.mxu0 %vm1859_vm0, %v1858_v3 }
 0x2d3   :  { %1578 = vmatprep.subr.bf16.mxu0 %v1858_v3 }
 0x2d6   :  { %1579 = vmatpush3.bf16.msra.mxu0 %v1947_v12 }
 0x2d7   :  { %1592 = vmatprep.subr.bf16.mxu0 %v1858_v3 }
 0x3a4   :  { %v218_v43 = vpop.f32.mrb[4].mxu0 }
 0x3a5   :  { %v224_v44 = vadd.f32 %v218_v43, %v176_v42  ;;  %v1566_v45 = vpop.f32.mrb[5].mxu0 }
 0x3a6   :  { %v221_v46 = vpop.f32.mrb[6].mxu0 }
 0x3a7   :  { %1710 = vtanh.f32 %v224_v44  ;;  %v1567_v47 = vpop.f32.mrb[7].mxu0  ;;  %v1458_v49 = vmul.f32 -1.442695, %v224_v44  ;;  %v410_v46 = vld [vmem:[#allocation2 + $0x8] sm:$0x3] }
 0x3a9   :  { %1712 = vpow2.f32 %v1458_v49 }
 0x3b1   :  { %v1711_v48 = vpop.eup %1710 }
 0x3b2   :  { %234 = vrot.lane.b32.xlu0 %v1711_v48, %s1861_s24 }
 0x3b3   :  { %v1713_v50 = vpop.eup %1712 }
 0x3b4   :  { %v228_v51 = vadd.f32 1.0, %v1713_v50 }
 0x3b6   :  { %1714 = vrcp.f32 %v228_v51 }
 0x3c0   :  { %v1715_v52 = vpop.eup %1714 }
 0x3c1   :  { %v232_v55 = vmul.f32 %v1715_v52, %v163_v36 }
 0x424   :  { %v235_v53 = vpop.permute.xlu0 %234 }
 0x425   :  { %v237_v54 = vmul.f32 %v1715_v52, %v235_v53 }
 0x427   :  { %239 = vrot.lane.b32.xlu1 %v237_v54, %s1862_s3 }
 0x499   :  { %v240_v56 = vpop.permute.xlu1 %239 }
 0x49a   :  { %v242_v57 = vadd.f32 %v240_v56, %v232_v55 }
 0x49c   :  { %1716 = vtanh.f32 %v242_v57 }
 0x4a6   :  { %v1717_v58 = vpop.eup %1716 }
 0x4a7   :  { %245 = vrot.lane.b32.xlu0 %v1717_v58, %s1861_s24 }
 0x519   :  { %v246_v59 = vpop.permute.xlu0 %245 }
 0x51a   :  { %v1987_v60 = vmul.f32 %v1715_v52, %v246_v59 }
 0x51c   :  { %v255_v61 = vpack.c.bf16 %v1987_v60, %v1987_v60 }
 0x51e   :  { %257 = vrot.lane.b32.xlu1 %v255_v61, %s1862_s3 }
 0x590   :  { %v258_v62 = vpop.permute.xlu1 %257 }
 0x591   :  { %1573 = vmatmul.mubr.msk.bf16.vlgmr.msra.gmra.mrb[4].mxu1 %vm101_vm2, %v258_v62 }
 0x592   :  { %1585 = vmatpush3.bf16.msra.mxu1 %v1936_v9  ;;  %1588 = vmatprep.mubr.msk.bf16.mxu1 %vm1859_vm0, %v1858_v3 }
 0x593   :  { %1586 = vmatprep.subr.bf16.mxu1 %v1858_v3 }
 0x596   :  { %1587 = vmatpush3.bf16.msra.mxu1 %v1947_v12 }
 0x597   :  { %1600 = vmatprep.subr.bf16.mxu1 %v1858_v3 }
 0x664   :  { %v296_v0 = vpop.f32.mrb[4].mxu1 }
 0x665   :  { %v302_v1 = vadd.f32 %v296_v0, %v254_v63  ;;  %v1574_v2 = vpop.f32.mrb[5].mxu1 }
 0x666   :  { %v299_v4 = vpop.f32.mrb[6].mxu1 }
 0x667   :  { %1718 = vtanh.f32 %v302_v1  ;;  %v1575_v5 = vpop.f32.mrb[7].mxu1  ;;  %v1460_v7 = vmul.f32 -1.442695, %v302_v1 }
 0x668   :  { %v488_v5 = vld [vmem:[#allocation2 + $0xa] sm:$0x3] }
 0x669   :  { %1720 = vpow2.f32 %v1460_v7 }
 0x671   :  { %v1719_v6 = vpop.eup %1718 }
 0x672   :  { %312 = vrot.lane.b32.xlu0 %v1719_v6, %s1861_s24 }
 0x673   :  { %v1721_v8 = vpop.eup %1720 }
 0x674   :  { %v306_v10 = vadd.f32 1.0, %v1721_v8 }
 0x676   :  { %1722 = vrcp.f32 %v306_v10 }
 0x680   :  { %v1723_v11 = vpop.eup %1722 }
 0x681   :  { %v310_v16 = vmul.f32 %v1723_v11, %v242_v57 }
 0x6e4   :  { %v313_v14 = vpop.permute.xlu0 %312 }
 0x6e5   :  { %v315_v15 = vmul.f32 %v1723_v11, %v313_v14 }
 0x6e7   :  { %317 = vrot.lane.b32.xlu1 %v315_v15, %s1862_s3 }
 0x759   :  { %v318_v17 = vpop.permute.xlu1 %317 }
 0x75a   :  { %v320_v18 = vadd.f32 %v318_v17, %v310_v16 }
 0x75c   :  { %1724 = vtanh.f32 %v320_v18 }
 0x766   :  { %v1725_v19 = vpop.eup %1724 }
 0x767   :  { %323 = vrot.lane.b32.xlu0 %v1725_v19, %s1861_s24 }
 0x7d9   :  { %v324_v20 = vpop.permute.xlu0 %323 }
 0x7da   :  { %v2002_v21 = vmul.f32 %v1723_v11, %v324_v20 }
 0x7dc   :  { %v333_v22 = vpack.c.bf16 %v2002_v21, %v2002_v21 }
 0x7de   :  { %335 = vrot.lane.b32.xlu1 %v333_v22, %s1862_s3 }
 0x850   :  { %v336_v23 = vpop.permute.xlu1 %335 }
 0x851   :  { %1581 = vmatmul.mubr.msk.bf16.vlgmr.msra.gmra.mrb[8].mxu0 %vm101_vm2, %v336_v23 }
 0x852   :  { %1593 = vmatpush3.bf16.msra.mxu0 %v1936_v9  ;;  %1596 = vmatprep.mubr.msk.bf16.mxu0 %vm1859_vm0, %v1858_v3 }
 0x853   :  { %1594 = vmatprep.subr.bf16.mxu0 %v1858_v3 }
 0x856   :  { %1595 = vmatpush3.bf16.msra.mxu0 %v1947_v12 }
 0x857   :  { %1608 = vmatprep.subr.bf16.mxu0 %v1858_v3 }
 0x924   :  { %v374_v25 = vpop.f32.mrb[8].mxu0 }
 0x925   :  { %v380_v26 = vadd.f32 %v374_v25, %v332_v24  ;;  %v1582_v27 = vpop.f32.mrb[9].mxu0 }
 0x926   :  { %v377_v28 = vpop.f32.mrb[10].mxu0 }
 0x927   :  { %1726 = vtanh.f32 %v380_v26  ;;  %v1583_v29 = vpop.f32.mrb[11].mxu0  ;;  %v1462_v31 = vmul.f32 -1.442695, %v380_v26  ;;  %v566_v28 = vld [vmem:[#allocation2 + $0xc] sm:$0x3] }
 0x929   :  { %1728 = vpow2.f32 %v1462_v31 }
 0x931   :  { %v1727_v30 = vpop.eup %1726 }
 0x932   :  { %390 = vrot.lane.b32.xlu0 %v1727_v30, %s1861_s24 }
 0x933   :  { %v1729_v32 = vpop.eup %1728 }
 0x934   :  { %v384_v33 = vadd.f32 1.0, %v1729_v32 }
 0x936   :  { %1730 = vrcp.f32 %v384_v33 }
 0x940   :  { %v1731_v34 = vpop.eup %1730 }
 0x941   :  { %v388_v37 = vmul.f32 %v1731_v34, %v320_v18 }
 0x9a4   :  { %v391_v35 = vpop.permute.xlu0 %390 }
 0x9a5   :  { %v393_v36 = vmul.f32 %v1731_v34, %v391_v35 }
 0x9a7   :  { %395 = vrot.lane.b32.xlu1 %v393_v36, %s1862_s3 }
 0xa19   :  { %v396_v38 = vpop.permute.xlu1 %395 }
 0xa1a   :  { %v398_v40 = vadd.f32 %v396_v38, %v388_v37 }
 0xa1c   :  { %1732 = vtanh.f32 %v398_v40 }
 0xa26   :  { %v1733_v41 = vpop.eup %1732 }
 0xa27   :  { %401 = vrot.lane.b32.xlu0 %v1733_v41, %s1861_s24 }
 0xa99   :  { %v402_v42 = vpop.permute.xlu0 %401 }
 0xa9a   :  { %v2017_v43 = vmul.f32 %v1731_v34, %v402_v42 }
 0xa9c   :  { %v411_v44 = vpack.c.bf16 %v2017_v43, %v2017_v43 }
 0xa9e   :  { %413 = vrot.lane.b32.xlu1 %v411_v44, %s1862_s3 }
 0xb10   :  { %v414_v45 = vpop.permute.xlu1 %413 }
 0xb11   :  { %1589 = vmatmul.mubr.msk.bf16.vlgmr.msra.gmra.mrb[8].mxu1 %vm101_vm2, %v414_v45 }
 0xb12   :  { %1601 = vmatpush3.bf16.msra.mxu1 %v1936_v9  ;;  %1604 = vmatprep.mubr.msk.bf16.mxu1 %vm1859_vm0, %v1858_v3 }
 0xb13   :  { %1602 = vmatprep.subr.bf16.mxu1 %v1858_v3 }
 0xb16   :  { %1603 = vmatpush3.bf16.msra.mxu1 %v1947_v12 }
 0xb17   :  { %1616 = vmatprep.subr.bf16.mxu1 %v1858_v3 }
 0xbe4   :  { %v452_v47 = vpop.f32.mrb[8].mxu1 }
 0xbe5   :  { %v458_v48 = vadd.f32 %v452_v47, %v410_v46  ;;  %v1590_v49 = vpop.f32.mrb[9].mxu1 }
 0xbe6   :  { %v455_v50 = vpop.f32.mrb[10].mxu1 }
 0xbe7   :  { %1734 = vtanh.f32 %v458_v48  ;;  %v1591_v51 = vpop.f32.mrb[11].mxu1  ;;  %v1464_v53 = vmul.f32 -1.442695, %v458_v48 }
 0xbe8   :  { %v644_v51 = vld [vmem:[#allocation2 + $0xe] sm:$0x3] }
 0xbe9   :  { %1736 = vpow2.f32 %v1464_v53 }
 0xbf1   :  { %v1735_v52 = vpop.eup %1734 }
 0xbf2   :  { %468 = vrot.lane.b32.xlu0 %v1735_v52, %s1861_s24 }
 0xbf3   :  { %v1737_v54 = vpop.eup %1736 }
 0xbf4   :  { %v462_v55 = vadd.f32 1.0, %v1737_v54 }
 0xbf6   :  { %1738 = vrcp.f32 %v462_v55 }
 0xc00   :  { %v1739_v56 = vpop.eup %1738 }
 0xc01   :  { %v466_v59 = vmul.f32 %v1739_v56, %v398_v40 }
 0xc64   :  { %v469_v57 = vpop.permute.xlu0 %468 }
 0xc65   :  { %v471_v58 = vmul.f32 %v1739_v56, %v469_v57 }
 0xc67   :  { %473 = vrot.lane.b32.xlu1 %v471_v58, %s1862_s3 }
 0xcd9   :  { %v474_v61 = vpop.permute.xlu1 %473 }
 0xcda   :  { %v476_v62 = vadd.f32 %v474_v61, %v466_v59 }
 0xcdc   :  { %1740 = vtanh.f32 %v476_v62 }
 0xce6   :  { %v1741_v63 = vpop.eup %1740 }
 0xce7   :  { %479 = vrot.lane.b32.xlu0 %v1741_v63, %s1861_s24 }
 0xd59   :  { %v480_v0 = vpop.permute.xlu0 %479 }
 0xd5a   :  { %v2032_v1 = vmul.f32 %v1739_v56, %v480_v0 }
 0xd5c   :  { %v489_v2 = vpack.c.bf16 %v2032_v1, %v2032_v1 }
 0xd5e   :  { %491 = vrot.lane.b32.xlu1 %v489_v2, %s1862_s3 }
 0xdd0   :  { %v492_v4 = vpop.permute.xlu1 %491 }
 0xdd1   :  { %1597 = vmatmul.mubr.msk.bf16.vlgmr.msra.gmra.mrb[12].mxu0 %vm101_vm2, %v492_v4 }
 0xdd2   :  { %1609 = vmatpush3.bf16.msra.mxu0 %v1936_v9  ;;  %1612 = vmatprep.mubr.msk.bf16.mxu0 %vm1859_vm0, %v1858_v3 }
 0xdd3   :  { %1610 = vmatprep.subr.bf16.mxu0 %v1858_v3 }
 0xdd6   :  { %1611 = vmatpush3.bf16.msra.mxu0 %v1947_v12 }
 0xdd7   :  { %1624 = vmatprep.subr.bf16.mxu0 %v1858_v3 }
 0xea4   :  { %v530_v6 = vpop.f32.mrb[12].mxu0 }
 0xea5   :  { %v536_v7 = vadd.f32 %v530_v6, %v488_v5  ;;  %v1598_v8 = vpop.f32.mrb[13].mxu0 }
 0xea6   :  { %v533_v10 = vpop.f32.mrb[14].mxu0 }
 0xea7   :  { %1742 = vtanh.f32 %v536_v7  ;;  %v1599_v11 = vpop.f32.mrb[15].mxu0  ;;  %v1466_v9 = vmul.f32 -1.442695, %v536_v7  ;;  %v726_v10 = vld [vmem:[%s2244_s4 + $0x8] sm:$0xff] }
 0xea8   :  { %v727_v11 = vld [vmem:[%s2244_s4 + $0x10] sm:$0xff] }
 0xea9   :  { %1744 = vpow2.f32 %v1466_v9  ;;  %v784_v9 = vld [vmem:[%s2245_s5] sm:$0xff] }
 0xeb1   :  { %v1743_v14 = vpop.eup %1742 }
 0xeb2   :  { %546 = vrot.lane.b32.xlu0 %v1743_v14, %s1861_s24 }
 0xeb3   :  { %v1745_v15 = vpop.eup %1744 }
 0xeb4   :  { %v540_v16 = vadd.f32 1.0, %v1745_v15  ;;  %v785_v15 = vld [vmem:[%s2245_s5 + $0x8] sm:$0xff] }
 0xeb6   :  { %1746 = vrcp.f32 %v540_v16  ;;  %v2102_v16 = vpack.c.bf16 %v785_v15, %v784_v9 }
 0xec0   :  { %v1747_v17 = vpop.eup %1746 }
 0xec1   :  { %v544_v19 = vmul.f32 %v1747_v17, %v476_v62 }
 0xf24   :  { %v547_v18 = vpop.permute.xlu0 %546 }
 0xf25   :  { %v549_v12 = vmul.f32 %v1747_v17, %v547_v18  ;;  %v786_v18 = vld [vmem:[%s2245_s5 + $0x10] sm:$0xff] }
 0xf27   :  { %551 = vrot.lane.b32.xlu1 %v549_v12, %s1862_s3  ;;  %v787_v12 = vld [vmem:[%s2245_s5 + $0x18] sm:$0xff] }
 0xf99   :  { %v552_v20 = vpop.permute.xlu1 %551 }
 0xf9a   :  { %v554_v22 = vadd.f32 %v552_v20, %v544_v19  ;;  %v2111_v20 = vpack.c.bf16 %v787_v12, %v786_v18 }
 0xf9c   :  { %1748 = vtanh.f32 %v554_v22 }
 0xfa6   :  { %v1749_v23 = vpop.eup %1748 }
 0xfa7   :  { %557 = vrot.lane.b32.xlu0 %v1749_v23, %s1861_s24 }
0x1019   :  { %v558_v24 = vpop.permute.xlu0 %557 }
0x101a   :  { %v2047_v25 = vmul.f32 %v1747_v17, %v558_v24 }
0x101c   :  { %v567_v26 = vpack.c.bf16 %v2047_v25, %v2047_v25 }
0x101e   :  { %569 = vrot.lane.b32.xlu1 %v567_v26, %s1862_s3 }
0x1090   :  { %v570_v27 = vpop.permute.xlu1 %569 }
0x1091   :  { %1605 = vmatmul.mubr.msk.bf16.vlgmr.msra.gmra.mrb[12].mxu1 %vm101_vm2, %v570_v27 }
0x1092   :  { %1620 = vmatprep.mubr.msk.bf16.mxu1 %vm1859_vm0, %v1858_v3 }
0x1164   :  { %v608_v29 = vpop.f32.mrb[12].mxu1 }
0x1165   :  { %v614_v30 = vadd.f32 %v608_v29, %v566_v28  ;;  %v1606_v31 = vpop.f32.mrb[13].mxu1 }
0x1166   :  { %v611_v32 = vpop.f32.mrb[14].mxu1 }
0x1167   :  { %1750 = vtanh.f32 %v614_v30  ;;  %v1607_v33 = vpop.f32.mrb[15].mxu1  ;;  %v1468_v35 = vmul.f32 -1.442695, %v614_v30  ;;  %v1471_v32 = vld [vmem:[%s2246_s6] ss:$0 sm:$0xff] }
0x1169   :  { %1752 = vpow2.f32 %v1468_v35 }
0x1171   :  { %v1751_v34 = vpop.eup %1750 }
0x1172   :  { %624 = vrot.lane.b32.xlu0 %v1751_v34, %s1861_s24 }
0x1173   :  { %v1753_v36 = vpop.eup %1752 }
0x1174   :  { %v618_v37 = vadd.f32 1.0, %v1753_v36 }
0x1176   :  { %1754 = vrcp.f32 %v618_v37 }
0x1180   :  { %v1755_v38 = vpop.eup %1754 }
0x1181   :  { %v622_v42 = vmul.f32 %v1755_v38, %v554_v22 }
0x11e4   :  { %v625_v40 = vpop.permute.xlu0 %624 }
0x11e5   :  { %v627_v41 = vmul.f32 %v1755_v38, %v625_v40 }
0x11e7   :  { %629 = vrot.lane.b32.xlu1 %v627_v41, %s1862_s3 }
0x1259   :  { %v630_v44 = vpop.permute.xlu1 %629 }
0x125a   :  { %v632_v45 = vadd.f32 %v630_v44, %v622_v42 }
0x125c   :  { %1756 = vtanh.f32 %v632_v45 }
0x1266   :  { %v1757_v46 = vpop.eup %1756 }
0x1267   :  { %635 = vrot.lane.b32.xlu0 %v1757_v46, %s1861_s24 }
0x12d9   :  { %v636_v47 = vpop.permute.xlu0 %635 }
0x12da   :  { %v638_v48 = vmul.f32 %v1755_v38, %v636_v47 }
0x12dc   :  { %v645_v49 = vpack.c.bf16 %v638_v48, %v638_v48 }
0x12de   :  { %647 = vrot.lane.b32.xlu1 %v645_v49, %s1862_s3 }
0x1350   :  { %v648_v50 = vpop.permute.xlu1 %647 }
0x1351   :  { %1613 = vmatmul.mubr.msk.bf16.vlgmr.msra.gmra.mrb[16].mxu0 %vm101_vm2, %v648_v50 }
0x1352   :  { %1628 = vmatprep.mubr.msk.bf16.mxu0 %vm1859_vm0, %v1858_v3  ;;  %1625 = vmatpush3.bf16.msra.mxu0 %v2102_v16 }
0x1353   :  { %1626 = vmatprep.subr.bf16.mxu0 %v1858_v3 }
0x1356   :  { %1627 = vmatpush3.bf16.msra.mxu0 %v2111_v20 }
0x1357   :  { %1640 = vmatprep.subr.bf16.mxu0 %v1858_v3 }
0x1359   :  { %1629 = vmatmul.mubr.bf16.vlgmr.msra.gmra.mrb[20].mxu0 %v1860_v13 }
0x135a   :  { %1641 = vmatpush3.bf16.msra.mxu0 %v2102_v16  ;;  %1644 = vmatprep.mubr.msk.bf16.mxu0 %vm1859_vm0, %v1858_v3 }
0x135b   :  { %1642 = vmatprep.subr.bf16.mxu0 %v1858_v3 }
0x135e   :  { %1643 = vmatpush3.bf16.msra.mxu0 %v2111_v20 }
0x135f   :  { %1656 = vmatprep.subr.bf16.mxu0 %v1858_v3 }
0x1424   :  { %v686_v52 = vpop.f32.mrb[16].mxu0 }
0x1425   :  { %v692_v53 = vadd.f32 %v686_v52, %v644_v51  ;;  %v1614_v54 = vpop.f32.mrb[17].mxu0 }
0x1426   :  { %v689_v55 = vpop.f32.mrb[18].mxu0 }
0x1427   :  { %1758 = vtanh.f32 %v692_v53  ;;  %v1615_v56 = vpop.f32.mrb[19].mxu0  ;;  %v1470_v58 = vmul.f32 -1.442695, %v692_v53 }
0x1429   :  { %1760 = vpow2.f32 %v1470_v58 }
0x142c   :  { %v825_v28 = vpop.f32.mrb[20].mxu0 }
0x142d   :  { %v1630_v29 = vpop.f32.mrb[21].mxu0 }
0x142e   :  { %v828_v30 = vpop.f32.mrb[22].mxu0 }
0x142f   :  { %v1631_v31 = vpop.f32.mrb[23].mxu0 }
0x1431   :  { %v1759_v57 = vpop.eup %1758 }
0x1432   :  { %702 = vrot.lane.b32.xlu0 %v1759_v57, %s1861_s24 }
0x1433   :  { %v1761_v59 = vpop.eup %1760 }
0x1434   :  { %v696_v61 = vadd.f32 1.0, %v1761_v59 }
0x1436   :  { %1762 = vrcp.f32 %v696_v61 }
0x1440   :  { %v1763_v62 = vpop.eup %1762 }
0x1441   :  { %v700_v2 = vmul.f32 %v1763_v62, %v632_v45 }
0x14a4   :  { %v703_v63 = vpop.permute.xlu0 %702 }
0x14a5   :  { %v705_v0 = vmul.f32 %v1763_v62, %v703_v63 }
0x14a7   :  { %707 = vrot.lane.b32.xlu1 %v705_v0, %s1862_s3 }
0x14ab   :  { %171 = vrot.lane.b32.xlu1 %v1972_v39, %s1862_s3 }
0x14af   :  { %328 = vrot.lane.b32.xlu1 %v2002_v21, %s1862_s3 }
0x14b3   :  { %484 = vrot.lane.b32.xlu1 %v2032_v1, %s1862_s3  ;;  %v725_v1 = vld [vmem:[%s2244_s4] sm:$0xff] }
0x14b4   :  { %v729_v14 = vpack.c.bf16 %v726_v10, %v725_v1 }
0x14b6   :  { %1617 = vmatpush3.bf16.msra.mxu1 %v729_v14 }
0x14b7   :  { %640 = vrot.lane.b32.xlu1 %v638_v48, %s1862_s3  ;;  %1618 = vmatprep.subr.bf16.mxu1 %v1858_v3 }
0x1519   :  { %v708_v4 = vpop.permute.xlu1 %707 }
0x151a   :  { %v710_v5 = vadd.f32 %v708_v4, %v700_v2 }
0x151c   :  { %1764 = vtanh.f32 %v710_v5 }
0x151d   :  { %v172_v6 = vpop.permute.xlu1 %171 }
0x151e   :  { %175 = vst.msk [vmem:[#allocation3] sm:$0x3] %vm174_vm3, %v172_v6 }
0x1521   :  { %v329_v7 = vpop.permute.xlu1 %328 }
0x1522   :  { %331 = vst.msk [vmem:[#allocation3 + $0x4] sm:$0x3] %vm174_vm3, %v329_v7 }
0x1525   :  { %v485_v39 = vpop.permute.xlu1 %484 }
0x1526   :  { %v1765_v8 = vpop.eup %1764  ;;  %487 = vst.msk [vmem:[#allocation3 + $0x8] sm:$0x3] %vm174_vm3, %v485_v39 }
0x1527   :  { %713 = vrot.lane.b32.xlu0 %v1765_v8, %s1861_s24 }
0x1529   :  { %v641_v21 = vpop.permute.xlu1 %640 }
0x152a   :  { %643 = vst.msk [vmem:[#allocation3 + $0xc] sm:$0x3] %vm174_vm3, %v641_v21 }
0x152b   :  { %250 = vrot.lane.b32.xlu0 %v1987_v60, %s1862_s3  ;;  %v728_v60 = vld [vmem:[%s2244_s4 + $0x18] sm:$0xff] }
0x152f   :  { %406 = vrot.lane.b32.xlu0 %v2017_v43, %s1862_s3  ;;  %v730_v43 = vpack.c.bf16 %v728_v60, %v727_v11 }
0x1531   :  { %1619 = vmatpush3.bf16.msra.mxu1 %v730_v43 }
0x1532   :  { %1632 = vmatprep.subr.bf16.mxu1 %v1858_v3 }
0x1533   :  { %562 = vrot.lane.b32.xlu0 %v2047_v25, %s1862_s3 }
0x1599   :  { %v714_v17 = vpop.permute.xlu0 %713 }
0x159a   :  { %v716_v19 = vmul.f32 %v1763_v62, %v714_v17 }
0x159c   :  { %718 = vrot.lane.b32.xlu0 %v716_v19, %s1862_s3 }
0x159d   :  { %v251_v22 = vpop.permute.xlu0 %250 }
0x159e   :  { %253 = vst.msk [vmem:[#allocation3 + $0x2] sm:$0x3] %vm174_vm3, %v251_v22 }
0x15a1   :  { %v407_v23 = vpop.permute.xlu0 %406 }
0x15a2   :  { %409 = vst.msk [vmem:[#allocation3 + $0x6] sm:$0x3] %vm174_vm3, %v407_v23 }
0x15a5   :  { %v563_v24 = vpop.permute.xlu0 %562 }
0x15a6   :  { %565 = vst.msk [vmem:[#allocation3 + $0xa] sm:$0x3] %vm174_vm3, %v563_v24 }
0x15a9   :  { %v722_v13 = vld [vmem:[#allocation3] sm:$0xff] }
0x160e   :  { %v719_v25 = vpop.permute.xlu0 %718 }
0x160f   :  { %721 = vst.msk [vmem:[#allocation3 + $0xe] sm:$0x3] %vm174_vm3, %v719_v25 }
0x1616   :  { %v723_v26 = vld [vmem:[#allocation3 + $0x8] sm:$0xff] }
0x1617   :  { %v724_v27 = vpack.c.bf16 %v723_v26, %v722_v13 }
0x1619   :  { %1621 = vmatmul.mubr.msk.bf16.vlgmr.msra.gmra.mrb[16].mxu1 %vm101_vm2, %v724_v27 }
0x161a   :  { %1633 = vmatpush3.bf16.msra.mxu1 %v2102_v16  ;;  %1636 = vmatprep.mubr.msk.bf16.mxu1 %vm1859_vm0, %v1858_v3 }
0x161b   :  { %1634 = vmatprep.subr.bf16.mxu1 %v1858_v3 }
0x161e   :  { %1635 = vmatpush3.bf16.msra.mxu1 %v2111_v20 }
0x161f   :  { %1648 = vmatprep.subr.bf16.mxu1 %v1858_v3 }
0x16ec   :  { %v775_v33 = vpop.f32.mrb[16].mxu1 }
0x16ed   :  { %v776_v34 = vadd.f32 %v1471_v32, %v775_v33  ;;  %v1622_v35 = vpop.f32.mrb[17].mxu1 }
0x16ee   :  { %v778_v36 = vpop.f32.mrb[18].mxu1 }
0x16ef   :  { %782 = vst [vmem:[#allocation2] sm:$0xff] %v776_v34  ;;  %v779_v37 = vadd.f32 %v1471_v32, %v778_v36  ;;  %v1623_v38 = vpop.f32.mrb[19].mxu1 }
0x16f1   :  { %783 = vst [vmem:[#allocation2 + $0x8] sm:$0xff] %v779_v37 }
0x16f6   :  { %v790_v40 = vld [vmem:[#allocation2] sm:$0x3]  ;;  %v856_v58 = vld [vmem:[#allocation2 + $0x2] sm:$0x3]  ;;  %v929_v15 = vld [vmem:[#allocation2 + $0x4] sm:$0x3] }
0x16f7   :  { %v831_v41 = vadd.f32 %v825_v28, %v790_v40  ;;  %v1002_v37 = vld [vmem:[#allocation2 + $0x6] sm:$0x3] }
0x16f9   :  { %1766 = vtanh.f32 %v831_v41  ;;  %v1473_v44 = vmul.f32 -1.442695, %v831_v41 }
0x16fb   :  { %1768 = vpow2.f32 %v1473_v44 }
0x1703   :  { %v1767_v42 = vpop.eup %1766 }
0x1704   :  { %841 = vrot.lane.b32.xlu1 %v1767_v42, %s1861_s24 }
0x1705   :  { %v1769_v45 = vpop.eup %1768 }
0x1706   :  { %v835_v46 = vadd.f32 1.0, %v1769_v45 }
0x1708   :  { %1770 = vrcp.f32 %v835_v46 }
0x1712   :  { %v1771_v47 = vpop.eup %1770 }
0x1713   :  { %v839_v50 = vmul.f32 0.0, %v1771_v47 }
0x1776   :  { %v842_v48 = vpop.permute.xlu1 %841 }
0x1777   :  { %v844_v49 = vmul.f32 %v1771_v47, %v842_v48 }
0x1779   :  { %846 = vrot.lane.b32.xlu0 %v844_v49, %s1862_s3 }
0x17eb   :  { %v847_v51 = vpop.permute.xlu0 %846 }
0x17ec   :  { %v849_v52 = vadd.f32 %v847_v51, %v839_v50 }
0x17ee   :  { %1772 = vtanh.f32 %v849_v52 }
0x17f8   :  { %v1773_v53 = vpop.eup %1772 }
0x17f9   :  { %852 = vrot.lane.b32.xlu1 %v1773_v53, %s1861_s24 }
0x186b   :  { %v853_v54 = vpop.permute.xlu1 %852 }
0x186c   :  { %v855_v55 = vmul.f32 %v1771_v47, %v853_v54 }
0x186e   :  { %v857_v56 = vpack.c.bf16 %v855_v55, %v855_v55 }
0x1870   :  { %859 = vrot.lane.b32.xlu0 %v857_v56, %s1862_s3 }
0x18e2   :  { %v860_v57 = vpop.permute.xlu0 %859 }
0x18e3   :  { %1637 = vmatmul.mubr.msk.bf16.vlgmr.msra.gmra.mrb[20].mxu1 %vm101_vm2, %v860_v57 }
0x18e4   :  { %1649 = vmatpush3.bf16.msra.mxu1 %v2102_v16  ;;  %1652 = vmatprep.mubr.msk.bf16.mxu1 %vm1859_vm0, %v1858_v3 }
0x18e5   :  { %1650 = vmatprep.subr.bf16.mxu1 %v1858_v3 }
0x18e8   :  { %1651 = vmatpush3.bf16.msra.mxu1 %v2111_v20 }
0x18e9   :  { %1664 = vmatprep.subr.bf16.mxu1 %v1858_v3 }
0x19b6   :  { %v898_v59 = vpop.f32.mrb[20].mxu1 }
0x19b7   :  { %v904_v61 = vadd.f32 %v898_v59, %v856_v58  ;;  %v1638_v62 = vpop.f32.mrb[21].mxu1 }
0x19b8   :  { %v901_v63 = vpop.f32.mrb[22].mxu1 }
0x19b9   :  { %1774 = vtanh.f32 %v904_v61  ;;  %v1639_v0 = vpop.f32.mrb[23].mxu1  ;;  %v1475_v4 = vmul.f32 -1.442695, %v904_v61  ;;  %v1075_v61 = vld [vmem:[#allocation2 + $0x8] sm:$0x3] }
0x19bb   :  { %1776 = vpow2.f32 %v1475_v4 }
0x19c3   :  { %v1775_v2 = vpop.eup %1774 }
0x19c4   :  { %914 = vrot.lane.b32.xlu1 %v1775_v2, %s1861_s24 }
0x19c5   :  { %v1777_v5 = vpop.eup %1776 }
0x19c6   :  { %v908_v6 = vadd.f32 1.0, %v1777_v5 }
0x19c8   :  { %1778 = vrcp.f32 %v908_v6 }
0x19d2   :  { %v1779_v7 = vpop.eup %1778 }
0x19d3   :  { %v912_v21 = vmul.f32 %v1779_v7, %v849_v52 }
0x1a36   :  { %v915_v39 = vpop.permute.xlu1 %914 }
0x1a37   :  { %v917_v8 = vmul.f32 %v1779_v7, %v915_v39 }
0x1a39   :  { %919 = vrot.lane.b32.xlu0 %v917_v8, %s1862_s3 }
0x1aab   :  { %v920_v1 = vpop.permute.xlu0 %919 }
0x1aac   :  { %v922_v10 = vadd.f32 %v920_v1, %v912_v21 }
0x1aae   :  { %1780 = vtanh.f32 %v922_v10 }
0x1ab8   :  { %v1781_v11 = vpop.eup %1780 }
0x1ab9   :  { %925 = vrot.lane.b32.xlu1 %v1781_v11, %s1861_s24 }
0x1b2b   :  { %v926_v14 = vpop.permute.xlu1 %925 }
0x1b2c   :  { %v928_v60 = vmul.f32 %v1779_v7, %v926_v14 }
0x1b2e   :  { %v930_v43 = vpack.c.bf16 %v928_v60, %v928_v60 }
0x1b30   :  { %932 = vrot.lane.b32.xlu0 %v930_v43, %s1862_s3 }
0x1ba2   :  { %v933_v9 = vpop.permute.xlu0 %932 }
0x1ba3   :  { %1645 = vmatmul.mubr.msk.bf16.vlgmr.msra.gmra.mrb[24].mxu0 %vm101_vm2, %v933_v9 }
0x1ba4   :  { %1657 = vmatpush3.bf16.msra.mxu0 %v2102_v16  ;;  %1660 = vmatprep.mubr.msk.bf16.mxu0 %vm1859_vm0, %v1858_v3 }
0x1ba5   :  { %1658 = vmatprep.subr.bf16.mxu0 %v1858_v3 }
0x1ba8   :  { %1659 = vmatpush3.bf16.msra.mxu0 %v2111_v20 }
0x1ba9   :  { %1672 = vmatprep.subr.bf16.mxu0 %v1858_v3 }
0x1c76   :  { %v971_v17 = vpop.f32.mrb[24].mxu0 }
0x1c77   :  { %v977_v18 = vadd.f32 %v971_v17, %v929_v15  ;;  %v1646_v12 = vpop.f32.mrb[25].mxu0 }
0x1c78   :  { %v974_v19 = vpop.f32.mrb[26].mxu0 }
0x1c79   :  { %1782 = vtanh.f32 %v977_v18  ;;  %v1647_v22 = vpop.f32.mrb[27].mxu0  ;;  %v1477_v24 = vmul.f32 -1.442695, %v977_v18  ;;  %v1148_v18 = vld [vmem:[#allocation2 + $0xa] sm:$0x3] }
0x1c7b   :  { %1784 = vpow2.f32 %v1477_v24 }
0x1c83   :  { %v1783_v23 = vpop.eup %1782 }
0x1c84   :  { %987 = vrot.lane.b32.xlu1 %v1783_v23, %s1861_s24 }
0x1c85   :  { %v1785_v25 = vpop.eup %1784 }
0x1c86   :  { %v981_v13 = vadd.f32 1.0, %v1785_v25 }
0x1c88   :  { %1786 = vrcp.f32 %v981_v13 }
0x1c92   :  { %v1787_v26 = vpop.eup %1786 }
0x1c93   :  { %v985_v29 = vmul.f32 %v1787_v26, %v922_v10 }
0x1cf6   :  { %v988_v27 = vpop.permute.xlu1 %987 }
0x1cf7   :  { %v990_v28 = vmul.f32 %v1787_v26, %v988_v27 }
0x1cf9   :  { %992 = vrot.lane.b32.xlu0 %v990_v28, %s1862_s3 }
0x1d6b   :  { %v993_v30 = vpop.permute.xlu0 %992 }
0x1d6c   :  { %v995_v31 = vadd.f32 %v993_v30, %v985_v29 }
0x1d6e   :  { %1788 = vtanh.f32 %v995_v31 }
0x1d78   :  { %v1789_v32 = vpop.eup %1788 }
0x1d79   :  { %998 = vrot.lane.b32.xlu1 %v1789_v32, %s1861_s24 }
0x1deb   :  { %v999_v33 = vpop.permute.xlu1 %998 }
0x1dec   :  { %v1001_v34 = vmul.f32 %v1787_v26, %v999_v33 }
0x1dee   :  { %v1003_v35 = vpack.c.bf16 %v1001_v34, %v1001_v34 }
0x1df0   :  { %1005 = vrot.lane.b32.xlu0 %v1003_v35, %s1862_s3 }
0x1e62   :  { %v1006_v36 = vpop.permute.xlu0 %1005 }
0x1e63   :  { %1653 = vmatmul.mubr.msk.bf16.vlgmr.msra.gmra.mrb[24].mxu1 %vm101_vm2, %v1006_v36 }
0x1e64   :  { %1665 = vmatpush3.bf16.msra.mxu1 %v2102_v16  ;;  %1668 = vmatprep.mubr.msk.bf16.mxu1 %vm1859_vm0, %v1858_v3 }
0x1e65   :  { %1666 = vmatprep.subr.bf16.mxu1 %v1858_v3 }
0x1e68   :  { %1667 = vmatpush3.bf16.msra.mxu1 %v2111_v20 }
0x1e69   :  { %1680 = vmatprep.subr.bf16.mxu1 %v1858_v3 }
0x1f36   :  { %v1044_v38 = vpop.f32.mrb[24].mxu1 }
0x1f37   :  { %v1050_v40 = vadd.f32 %v1044_v38, %v1002_v37  ;;  %v1654_v41 = vpop.f32.mrb[25].mxu1  ;;  %v1221_v37 = vld [vmem:[#allocation2 + $0xc] sm:$0x3] }
0x1f38   :  { %v1047_v42 = vpop.f32.mrb[26].mxu1 }
0x1f39   :  { %1790 = vtanh.f32 %v1050_v40  ;;  %v1655_v44 = vpop.f32.mrb[27].mxu1  ;;  %v1479_v46 = vmul.f32 -1.442695, %v1050_v40 }
0x1f3b   :  { %1792 = vpow2.f32 %v1479_v46 }
0x1f43   :  { %v1791_v45 = vpop.eup %1790 }
0x1f44   :  { %1060 = vrot.lane.b32.xlu1 %v1791_v45, %s1861_s24 }
0x1f45   :  { %v1793_v47 = vpop.eup %1792 }
0x1f46   :  { %v1054_v48 = vadd.f32 1.0, %v1793_v47 }
0x1f48   :  { %1794 = vrcp.f32 %v1054_v48 }
0x1f52   :  { %v1795_v49 = vpop.eup %1794 }
0x1f53   :  { %v1058_v52 = vmul.f32 %v1795_v49, %v995_v31 }
0x1fb6   :  { %v1061_v50 = vpop.permute.xlu1 %1060 }
0x1fb7   :  { %v1063_v51 = vmul.f32 %v1795_v49, %v1061_v50 }
0x1fb9   :  { %1065 = vrot.lane.b32.xlu0 %v1063_v51, %s1862_s3 }
0x202b   :  { %v1066_v53 = vpop.permute.xlu0 %1065 }
0x202c   :  { %v1068_v54 = vadd.f32 %v1066_v53, %v1058_v52 }
0x202e   :  { %1796 = vtanh.f32 %v1068_v54 }
0x2038   :  { %v1797_v55 = vpop.eup %1796 }
0x2039   :  { %1071 = vrot.lane.b32.xlu1 %v1797_v55, %s1861_s24 }
0x20ab   :  { %v1072_v56 = vpop.permute.xlu1 %1071 }
0x20ac   :  { %v1074_v57 = vmul.f32 %v1795_v49, %v1072_v56 }
0x20ae   :  { %v1076_v58 = vpack.c.bf16 %v1074_v57, %v1074_v57 }
0x20b0   :  { %1078 = vrot.lane.b32.xlu0 %v1076_v58, %s1862_s3 }
0x2122   :  { %v1079_v59 = vpop.permute.xlu0 %1078 }
0x2123   :  { %1661 = vmatmul.mubr.msk.bf16.vlgmr.msra.gmra.mrb[28].mxu0 %vm101_vm2, %v1079_v59 }
0x2124   :  { %1673 = vmatpush3.bf16.msra.mxu0 %v2102_v16  ;;  %1676 = vmatprep.mubr.msk.bf16.mxu0 %vm1859_vm0, %v1858_v3 }
0x2125   :  { %1674 = vmatprep.subr.bf16.mxu0 %v1858_v3 }
0x2128   :  { %1675 = vmatpush3.bf16.msra.mxu0 %v2111_v20 }
0x2129   :  { %1688 = vmatprep.subr.bf16.mxu0 %v1858_v3 }
0x21f6   :  { %v1117_v62 = vpop.f32.mrb[28].mxu0 }
0x21f7   :  { %v1123_v63 = vadd.f32 %v1117_v62, %v1075_v61  ;;  %v1662_v0 = vpop.f32.mrb[29].mxu0  ;;  %v1294_v61 = vld [vmem:[#allocation2 + $0xe] sm:$0x3] }
0x21f8   :  { %v1120_v2 = vpop.f32.mrb[30].mxu0 }
0x21f9   :  { %1798 = vtanh.f32 %v1123_v63  ;;  %v1663_v4 = vpop.f32.mrb[31].mxu0  ;;  %v1481_v6 = vmul.f32 -1.442695, %v1123_v63 }
0x21fb   :  { %1800 = vpow2.f32 %v1481_v6 }
0x2203   :  { %v1799_v5 = vpop.eup %1798 }
0x2204   :  { %1133 = vrot.lane.b32.xlu1 %v1799_v5, %s1861_s24 }
0x2205   :  { %v1801_v7 = vpop.eup %1800 }
0x2206   :  { %v1127_v39 = vadd.f32 1.0, %v1801_v7 }
0x2208   :  { %1802 = vrcp.f32 %v1127_v39 }
0x2212   :  { %v1803_v8 = vpop.eup %1802 }
0x2213   :  { %v1131_v10 = vmul.f32 %v1803_v8, %v1068_v54 }
0x2276   :  { %v1134_v21 = vpop.permute.xlu1 %1133 }
0x2277   :  { %v1136_v1 = vmul.f32 %v1803_v8, %v1134_v21 }
0x2279   :  { %1138 = vrot.lane.b32.xlu0 %v1136_v1, %s1862_s3 }
0x22eb   :  { %v1139_v11 = vpop.permute.xlu0 %1138 }
0x22ec   :  { %v1141_v14 = vadd.f32 %v1139_v11, %v1131_v10 }
0x22ee   :  { %1804 = vtanh.f32 %v1141_v14 }
0x22f8   :  { %v1805_v60 = vpop.eup %1804 }
0x22f9   :  { %1144 = vrot.lane.b32.xlu1 %v1805_v60, %s1861_s24  ;;  %v1368_v60 = vld [vmem:[%s2247_s7] sm:$0xff] }
0x236b   :  { %v1145_v43 = vpop.permute.xlu1 %1144 }
0x236c   :  { %v1147_v9 = vmul.f32 %v1803_v8, %v1145_v43  ;;  %v1369_v43 = vld [vmem:[%s2247_s7 + $0x8] sm:$0xff] }
0x236e   :  { %v1149_v15 = vpack.c.bf16 %v1147_v9, %v1147_v9  ;;  %v1370_v9 = vld [vmem:[%s2247_s7 + $0x10] sm:$0xff] }
0x2370   :  { %1151 = vrot.lane.b32.xlu0 %v1149_v15, %s1862_s3  ;;  %v1372_v15 = vpack.c.bf16 %v1369_v43, %v1368_v60 }
0x23e2   :  { %v1152_v17 = vpop.permute.xlu0 %1151 }
0x23e3   :  { %1669 = vmatmul.mubr.msk.bf16.vlgmr.msra.gmra.mrb[28].mxu1 %vm101_vm2, %v1152_v17  ;;  %v1371_v17 = vld [vmem:[%s2247_s7 + $0x18] sm:$0xff]  ;;  %s1863_s7 = smov [#allocation4]  }
0x23e4   :  { %1681 = vmatpush3.bf16.msra.mxu1 %v2102_v16  ;;  %1684 = vmatprep.mubr.msk.bf16.mxu1 %vm1859_vm0, %v1858_v3 }
0x23e5   :  { %1682 = vmatprep.subr.bf16.mxu1 %v1858_v3 }
0x23e8   :  { %1683 = vmatpush3.bf16.msra.mxu1 %v2111_v20 }
0x24b6   :  { %v1190_v12 = vpop.f32.mrb[28].mxu1 }
0x24b7   :  { %v1196_v19 = vadd.f32 %v1190_v12, %v1148_v18  ;;  %v1670_v22 = vpop.f32.mrb[29].mxu1  ;;  %v1373_v18 = vpack.c.bf16 %v1371_v17, %v1370_v9 }
0x24b8   :  { %v1193_v23 = vpop.f32.mrb[30].mxu1 }
0x24b9   :  { %1806 = vtanh.f32 %v1196_v19  ;;  %v1671_v24 = vpop.f32.mrb[31].mxu1  ;;  %v1483_v13 = vmul.f32 -1.442695, %v1196_v19 }
0x24bb   :  { %1808 = vpow2.f32 %v1483_v13 }
0x24c3   :  { %v1807_v25 = vpop.eup %1806 }
0x24c4   :  { %1206 = vrot.lane.b32.xlu1 %v1807_v25, %s1861_s24  ;;  %v1488_v25 = vld [vmem:[%s2248_s8] ss:$0 sm:$0xff]  ;;  %s1446_s8 = sshll.u32 %s1863_s7, 4  ;;  %s1447_s8 = int_to_ptr.vmem [resolvable:$true] %s1446_s8 }
0x24c5   :  { %v1809_v16 = vpop.eup %1808  ;;  %p1839_p1 = scmp.lt.s32.totalorder %s1447_s8, %s1447_s8 }
0x24c6   :  { %v1200_v26 = vadd.f32 1.0, %v1809_v16 }
0x24c8   :  { %1810 = vrcp.f32 %v1200_v26 }
0x24d2   :  { %v1811_v27 = vpop.eup %1810 }
0x24d3   :  { %v1204_v20 = vmul.f32 %v1811_v27, %v1141_v14 }
0x2536   :  { %v1207_v28 = vpop.permute.xlu1 %1206 }
0x2537   :  { %v1209_v29 = vmul.f32 %v1811_v27, %v1207_v28 }
0x2539   :  { %1211 = vrot.lane.b32.xlu0 %v1209_v29, %s1862_s3 }
0x25ab   :  { %v1212_v30 = vpop.permute.xlu0 %1211 }
0x25ac   :  { %v1214_v31 = vadd.f32 %v1212_v30, %v1204_v20 }
0x25ae   :  { %1812 = vtanh.f32 %v1214_v31 }
0x25b8   :  { %v1813_v32 = vpop.eup %1812 }
0x25b9   :  { %1217 = vrot.lane.b32.xlu1 %v1813_v32, %s1861_s24 }
0x262b   :  { %v1218_v33 = vpop.permute.xlu1 %1217 }
0x262c   :  { %v1220_v34 = vmul.f32 %v1811_v27, %v1218_v33 }
0x262e   :  { %v1222_v35 = vpack.c.bf16 %v1220_v34, %v1220_v34 }
0x2630   :  { %1224 = vrot.lane.b32.xlu0 %v1222_v35, %s1862_s3 }
0x26a2   :  { %v1225_v36 = vpop.permute.xlu0 %1224 }
0x26a3   :  { %1677 = vmatmul.mubr.msk.bf16.vlgmr.msra.gmra.mrb[32].mxu0 %vm101_vm2, %v1225_v36 }
0x26a4   :  { %1692 = vmatprep.mubr.msk.bf16.mxu0 %vm1859_vm0, %v1858_v3  ;;  %1689 = vmatpush3.bf16.msra.mxu0 %v1372_v15 }
0x26a5   :  { %1690 = vmatprep.subr.bf16.mxu0 %v1858_v3 }
0x26a8   :  { %1691 = vmatpush3.bf16.msra.mxu0 %v1373_v18 }
0x2776   :  { %v1263_v38 = vpop.f32.mrb[32].mxu0 }
0x2777   :  { %v1269_v40 = vadd.f32 %v1263_v38, %v1221_v37  ;;  %v1678_v41 = vpop.f32.mrb[33].mxu0 }
0x2778   :  { %v1266_v42 = vpop.f32.mrb[34].mxu0 }
0x2779   :  { %1814 = vtanh.f32 %v1269_v40  ;;  %v1679_v44 = vpop.f32.mrb[35].mxu0  ;;  %v1485_v46 = vmul.f32 -1.442695, %v1269_v40 }
0x277b   :  { %1816 = vpow2.f32 %v1485_v46 }
0x2783   :  { %v1815_v45 = vpop.eup %1814 }
0x2784   :  { %1279 = vrot.lane.b32.xlu1 %v1815_v45, %s1861_s24 }
0x2785   :  { %v1817_v47 = vpop.eup %1816 }
0x2786   :  { %v1273_v48 = vadd.f32 1.0, %v1817_v47 }
0x2788   :  { %1818 = vrcp.f32 %v1273_v48 }
0x2792   :  { %v1819_v49 = vpop.eup %1818 }
0x2793   :  { %v1277_v52 = vmul.f32 %v1819_v49, %v1214_v31 }
0x27f6   :  { %v1280_v50 = vpop.permute.xlu1 %1279 }
0x27f7   :  { %v1282_v51 = vmul.f32 %v1819_v49, %v1280_v50 }
0x27f9   :  { %1284 = vrot.lane.b32.xlu0 %v1282_v51, %s1862_s3 }
0x286b   :  { %v1285_v53 = vpop.permute.xlu0 %1284 }
0x286c   :  { %v1287_v54 = vadd.f32 %v1285_v53, %v1277_v52 }
0x286e   :  { %1820 = vtanh.f32 %v1287_v54 }
0x2878   :  { %v1821_v55 = vpop.eup %1820 }
0x2879   :  { %1290 = vrot.lane.b32.xlu1 %v1821_v55, %s1861_s24 }
0x28eb   :  { %v1291_v56 = vpop.permute.xlu1 %1290 }
0x28ec   :  { %v1293_v57 = vmul.f32 %v1819_v49, %v1291_v56 }
0x28ee   :  { %v1295_v58 = vpack.c.bf16 %v1293_v57, %v1293_v57 }
0x28f0   :  { %1297 = vrot.lane.b32.xlu0 %v1295_v58, %s1862_s3 }
0x2962   :  { %v1298_v59 = vpop.permute.xlu0 %1297 }
0x2963   :  { %1685 = vmatmul.mubr.msk.bf16.vlgmr.msra.gmra.mrb[32].mxu1 %vm101_vm2, %v1298_v59 }
0x2a36   :  { %v1336_v62 = vpop.f32.mrb[32].mxu1 }
0x2a37   :  { %v1342_v63 = vadd.f32 %v1336_v62, %v1294_v61  ;;  %v1686_v0 = vpop.f32.mrb[33].mxu1 }
0x2a38   :  { %v1339_v2 = vpop.f32.mrb[34].mxu1 }
0x2a39   :  { %1822 = vtanh.f32 %v1342_v63  ;;  %v1687_v4 = vpop.f32.mrb[35].mxu1  ;;  %v1487_v6 = vmul.f32 -1.442695, %v1342_v63 }
0x2a3b   :  { %1824 = vpow2.f32 %v1487_v6 }
0x2a43   :  { %v1823_v5 = vpop.eup %1822 }
0x2a44   :  { %1352 = vrot.lane.b32.xlu1 %v1823_v5, %s1861_s24 }
0x2a45   :  { %v1825_v7 = vpop.eup %1824 }
0x2a46   :  { %v1346_v39 = vadd.f32 1.0, %v1825_v7 }
0x2a48   :  { %1826 = vrcp.f32 %v1346_v39 }
0x2a52   :  { %v1827_v8 = vpop.eup %1826 }
0x2a53   :  { %v1350_v10 = vmul.f32 %v1827_v8, %v1287_v54 }
0x2ab6   :  { %v1353_v21 = vpop.permute.xlu1 %1352 }
0x2ab7   :  { %v1355_v1 = vmul.f32 %v1827_v8, %v1353_v21 }
0x2ab9   :  { %1357 = vrot.lane.b32.xlu0 %v1355_v1, %s1862_s3 }
0x2b2b   :  { %v1358_v11 = vpop.permute.xlu0 %1357 }
0x2b2c   :  { %v1360_v14 = vadd.f32 %v1358_v11, %v1350_v10 }
0x2b2e   :  { %1828 = vtanh.f32 %v1360_v14 }
0x2b38   :  { %v1829_v12 = vpop.eup %1828 }
0x2b39   :  { %1363 = vrot.lane.b32.xlu1 %v1829_v12, %s1861_s24  ;;  %s1834_s24 = scalar_lea.vmem %s1447_s8, 32 }
0x2b3a   :  { %p1835_p0 = scmp.ne.s32.totalorder %s1447_s8, %s1834_s24  ;;  %p1840_p2 = scmp.lt.s32.totalorder %s1834_s24, %s1834_s24 }
0x2b3c   :  { %p1841_p3 = por %p1840_p2, %p1839_p1 }
0x2b3e   :  { %p1842_p4 = pnand %p1841_p3, %p1835_p0 }
0x2bab   :  { %v1364_v19 = vpop.permute.xlu1 %1363 }
0x2bac   :  { %v1366_v22 = vmul.f32 %v1827_v8, %v1364_v19 }
0x2bae   :  { %v1367_v23 = vpack.c.bf16 %v1366_v22, %v1366_v22 }
0x2bb0   :  { %1382 = vrot.lane.b32.xlu0 %v1367_v23, %s1862_s3 }
0x2c22   :  { %v1383_v24 = vpop.permute.xlu0 %1382 }
0x2c23   :  { %1693 = vmatmul.mubr.msk.bf16.vlgmr.msra.gmra.mrb[36].mxu0 %vm101_vm2, %v1383_v24 }
0x2cf6   :  { %v1421_v13 = vpop.f32.mrb[36].mxu0 }
0x2cf7   :  { %v1422_v16 = vadd.f32 %v1488_v25, %v1421_v13  ;;  %v1694_v3 = vpop.f32.mrb[37].mxu0 }
0x2cf8   :  { %v1424_v26 = vpop.f32.mrb[38].mxu0 }
0x2cf9   :  { %v1695_v27 = vpop.f32.mrb[39].mxu0  ;;  %v1428_v28 = vsel %vm1427_vm4, %v1422_v16, -inf }
0x2cfa   :  { %1429 = vmax.xlane.f32.xlu1 %v1428_v28 }
0x2d87   :  { %v1430_v29 = vpop.xlane.xlu1 %1429 }
0x2d88   :  { %v1431_v20 = vsub.f32 %v1422_v16, %v1430_v29 }
0x2d8a   :  { %v1432_v30 = vmul.f32 1.442695, %v1431_v20 }
0x2d8c   :  { %1830 = vpow2.f32 %v1432_v30 }
0x2d96   :  { %v1831_v31 = vpop.eup %1830 }
0x2d97   :  { %v1434_v32 = vsel %vm1427_vm4, %v1831_v31, 0.0 }
0x2d98   :  { %1435 = vadd.xlane.f32.xlu0 %v1434_v32 }
0x2e25   :  { %v1436_v33 = vpop.xlane.xlu0 %1435 }
0x2e26   :  { %1832 = vrcp.f32 %v1436_v33 }
0x2e30   :  { %v1833_v34 = vpop.eup %1832 }
0x2e31   :  { %v1438_v35 = vmul.f32 %v1833_v34, %v1831_v31 }
0x2e33   :  { %1439 = vst.msk [vmem:[#allocation4] sm:$0x3] %vm1427_vm4, %v1438_v35 }
0x2e34   :  { %1845 = shalt.err (!%p1842_p4)
}
0x2e35   :  { %s1846_s28 = scalar_lea.hbm %s2249_s9, 32 }
0x2e36   :  { %p1847_p5 = scmp.ne.s32.totalorder %s2249_s9, %s1846_s28  ;;  %p1850_p6 = scmp.lt.u32.totalorder %s1846_s28, %s2249_s9 }
0x2e38   :  { %p1852_p7 = pnand %p1850_p6, %p1847_p5 }
0x2e3a   :  { %1855 = shalt.err (!%p1852_p7)
}
0x2e3b   :  { %1449 = dma.vmem_to_hbm [thread:$0]  %s1447_s8, 32, %s2249_s9, [#allocation5]  }
0x2e3c   :  { %1856 = dma.done.wait [#allocation5], 32  }
0x2e3d   :  { %1857 = vsyncadd [#allocation5], 4294967264 }
0x2e3e   :  { %1453 = vsyncpa [#allocation5], 1 }

</bundles_post_ra>
